<compile_context>
chip_gen: v5e
topology: v5e:2x2
jax: 0.10.0
libtpu: 0.0.40
codegen_flags: <defaults>
</compile_context>

<pallas_src>
import functools
import math

import jax
import jax.numpy as jnp
from jax.experimental import pallas as pl
from jax.experimental.pallas import tpu as pltpu


def _round_up(x, m):
    return (x + m - 1) // m * m


def _pick_t_chunk(S, cap=32):
    """Largest chunk <= cap dividing S; otherwise minimal-padding chunk."""
    cap = max(1, min(cap, S))
    for c in range(cap, 0, -1):
        if S % c == 0 and c >= min(8, S):
            return c
    # No divisor >= 8 (e.g. prime S): minimize padded timesteps instead of
    # padding all the way up to `cap` chunks.
    n_chunks = math.ceil(S / cap)
    return math.ceil(S / n_chunks)


def _gru_seq_kernel(gi_ref, h0_ref, whh_ref, bhn_ref, out_ref, h_scratch,
                    *, hidden_p, t_chunk, unroll):
    """One grid step = t_chunk timesteps of the GRU recurrence for one batch block.

    grid = (batch_blocks ["parallel"], time_chunks ["arbitrary"])
    gi_ref:    (t_chunk, Bb, 3*Hp)  precomputed x@W_ih^T (+ folded r/z biases)
    h0_ref:    (Bb, Hp)             initial hidden state for this batch block
    whh_ref:   (Hp, 3*Hp)           W_hh^T (zero-padded)
    bhn_ref:   (1, Hp)              b_hh for the n-gate only
    out_ref:   (t_chunk, Bb, Hp)    hidden state at every timestep of the chunk
    h_scratch: VMEM (Bb, Hp)        hidden carried across time chunks
    """
    @pl.when(pl.program_id(1) == 0)          # first time-chunk of this batch block
    def _():
        h_scratch[...] = h0_ref[...]

    Hp = hidden_p
    # Hoist the (1,Hp) -> (Bb,Hp) broadcast out of the (unrolled) loop:
    # broadcast_in_dim is not CSE'd, so per-step broadcasts are pure waste.
    bhn = jnp.broadcast_to(bhn_ref[...], h_scratch.shape)

    def step(t, h):
        gi = gi_ref[t]                                            # (Bb, 3Hp)
        # Read the weight from its VMEM ref inside the loop body (NOT hoisted
        # to a value across the unrolled region) so its live range stays one
        # matmul long and Mosaic streams VMEM->MXU instead of spilling vregs.
        gh = jnp.dot(h.astype(whh_ref.dtype), whh_ref[...],
                     preferred_element_type=jnp.float32)          # (Bb, 3Hp)
        # PyTorch gate order: r, z, n (lane-aligned static slices, Hp % 128 == 0)
        r = jax.nn.sigmoid(gi[:, 0:Hp] + gh[:, 0:Hp])
        z = jax.nn.sigmoid(gi[:, Hp:2 * Hp] + gh[:, Hp:2 * Hp])
        n = jnp.tanh(gi[:, 2 * Hp:3 * Hp] + r * (gh[:, 2 * Hp:3 * Hp] + bhn))
        h_new = (1.0 - z) * n + z * h
        out_ref[t] = h_new.astype(out_ref.dtype)
        return h_new

    # Partial unroll: scheduler visibility (MXU/EUP/store overlap) without
    # blowing vreg live ranges / instruction memory at larger Hp.
    h = jax.lax.fori_loop(0, t_chunk, step, h_scratch[...],
                          unroll=max(1, min(unroll, t_chunk)))
    h_scratch[...] = h


def gru_layer(x, h0, w_ih, w_hh, b_ih, b_hh, *,
              t_chunk_cap=32, unroll=8, weight_dtype=jnp.float32):
    """One GRU layer over the full sequence.

    x: (S, B, I)   h0: (B, H)
    w_ih: (3H, I)  w_hh: (3H, H)  b_ih/b_hh: (3H,)
    returns (out (S, B, H), h_final (B, H))
    """
    S, B, I = x.shape
    H = h0.shape[-1]
    f32 = jnp.float32

    # Lane / sublane friendly padded sizes.
    Hp = _round_up(H, 128)            # lane-dense hidden dim
    Bp = _round_up(B, 8)              # full f32 sublanes
    t_chunk = _pick_t_chunk(S, cap=t_chunk_cap)
    Sp = _round_up(S, t_chunk)

    # Batch-parallel grid axis: engages the 2nd TensorCore on v7x when each
    # core keeps full 8-row sublanes; harmless serial axis elsewhere.
    n_bblk = 2 if (Bp >= 16 and Bp % 16 == 0) else 1
    Bb = Bp // n_bblk

    w_ih = w_ih.astype(f32)
    w_hh = w_hh.astype(f32)
    b_ih = b_ih.astype(f32)
    b_hh = b_hh.astype(f32)

    # Padded, transposed weights. Gate g occupies columns [g*Hp, g*Hp+H);
    # padded rows/cols are zero so padded hidden lanes provably stay exactly 0.
    wih_t = jnp.zeros((I, 3 * Hp), f32)
    whh_t = jnp.zeros((Hp, 3 * Hp), f32)
    b_gi = jnp.zeros((3 * Hp,), f32)          # folded biases for gi
    b_hn = jnp.zeros((1, Hp), f32)            # b_hh of the n-gate (kernel side)
    for g in range(3):
        wih_t = wih_t.at[:, g * Hp:g * Hp + H].set(w_ih[g * H:(g + 1) * H, :].T)
        whh_t = whh_t.at[:H, g * Hp:g * Hp + H].set(w_hh[g * H:(g + 1) * H, :].T)
        bg = b_ih[g * H:(g + 1) * H]
        if g < 2:                              # r, z: fold b_ih + b_hh into gi
            bg = bg + b_hh[g * H:(g + 1) * H]
        b_gi = b_gi.at[g * Hp:g * Hp + H].set(bg)
    b_hn = b_hn.at[0, :H].set(b_hh[2 * H:3 * H])
    whh_t = whh_t.astype(weight_dtype)        # bf16 keeps padded cols exactly 0

    # Pad the (small) input, not the 3x-larger projection: gi is produced
    # directly at (Sp, Bp, 3Hp) without an extra full-size HBM copy.  Padded
    # rows/timesteps only ever produce discarded outputs.
    x_p = x.astype(f32)
    if Sp != S or Bp != B:
        x_p = jnp.pad(x_p, ((0, Sp - S), (0, Bp - B), (0, 0)))
    # Hoisted input projection: one batched GEMM, default precision
    # (HIGHEST -> 3/6-pass f32 MXU emulation is unnecessary at 1e-4 tolerance).
    gi = jnp.einsum('sbi,ij->sbj', x_p, wih_t.astype(f32)) + b_gi    # (Sp,Bp,3Hp)

    h0p = jnp.pad(h0.astype(f32), ((0, Bp - B), (0, Hp - H)))

    kernel = functools.partial(_gru_seq_kernel, hidden_p=Hp,
                               t_chunk=t_chunk, unroll=unroll)

    # Constant-index weight block: single-buffer it when big enough to matter
    # (double-buffering a large W_hh^T can alone exceed v7x's 64 MiB VMEM).
    whh_bytes = whh_t.size * whh_t.dtype.itemsize
    whh_kw = {}
    if whh_bytes > 8 * 1024 * 1024:
        whh_kw = dict(pipeline_mode=pl.Buffered(1))

    in_specs = [
        pl.BlockSpec((t_chunk, Bb, 3 * Hp), lambda b, c: (c, b, 0)),   # gi chunk
        pl.BlockSpec((Bb, Hp), lambda b, c: (b, 0)),                   # h0
        pl.BlockSpec((Hp, 3 * Hp), lambda b, c: (0, 0), **whh_kw),     # W_hh^T
        pl.BlockSpec((1, Hp), lambda b, c: (0, 0)),                    # b_hh_n
    ]
    out_specs = pl.BlockSpec((t_chunk, Bb, Hp), lambda b, c: (c, b, 0))

    # Size the scoped VMEM limit from the actual buffer footprint (+ headroom)
    # rather than a flat 64 MiB (the whole per-TC VMEM on v7x).  Floor of
    # 32 MiB keeps compiler internal scratch comfortable on every generation.
    pipelined = 2 * t_chunk * Bb * (3 * Hp + Hp) * 4                 # gi + out, double-buffered
    const_bufs = (1 if whh_kw else 2) * whh_bytes + 2 * (Bb * Hp + Hp) * 4
    scratch_b = Bb * Hp * 4
    vmem_need = int((pipelined + const_bufs + scratch_b) * 1.25) + (2 << 20)
    vmem_limit = max(32 * 1024 * 1024, min(vmem_need, 100 * 1024 * 1024))

    out = pl.pallas_call(
        kernel,
        out_shape=jax.ShapeDtypeStruct((Sp, Bp, Hp), f32),
        grid_spec=pltpu.PrefetchScalarGridSpec(
            num_scalar_prefetch=0,
            grid=(n_bblk, Sp // t_chunk),
            in_specs=in_specs,
            out_specs=out_specs,
            scratch_shapes=[pltpu.VMEM((Bb, Hp), f32)],
        ),
        compiler_params=pltpu.CompilerParams(
            dimension_semantics=("parallel", "arbitrary"),
            vmem_limit_bytes=vmem_limit,
        ),
    )(gi, h0p, whh_t, b_hn)

    out = out[:S, :B, :H]
    h_fin = out[S - 1]          # final hidden derived in the wrapper (no per-step store)
    return out, h_fin


def rnn_forward(inputs, hidden, params):
    """Multi-layer GRU forward, matching nn.GRU(input_size, hidden_size, num_layers).

    inputs: (S, B, input_size), hidden: (n_layers, B, H)
    params: list of (w_ih, w_hh, b_ih, b_hh) per layer.
    Returns (output (S,B,H), hidden (n_layers,B,H)).
    """
    x = inputs
    finals = []
    for l, (w_ih, w_hh, b_ih, b_hh) in enumerate(params):
        x, h_fin = gru_layer(x, hidden[l], w_ih, w_hh, b_ih, b_hh)
        finals.append(h_fin)
    return x, jnp.stack(finals, axis=0)


def _gru_reference(inputs, hidden, params):
    """Pure-JAX reference for validation."""
    x = inputs
    finals = []
    for l, (w_ih, w_hh, b_ih, b_hh) in enumerate(params):
        H = w_hh.shape[1]
        h = hidden[l]
        outs = []
        for t in range(x.shape[0]):
            gi = x[t] @ w_ih.T + b_ih
            gh = h @ w_hh.T + b_hh
            i_r, i_z, i_n = gi[:, :H], gi[:, H:2 * H], gi[:, 2 * H:]
            h_r, h_z, h_n = gh[:, :H], gh[:, H:2 * H], gh[:, 2 * H:]
            r = jax.nn.sigmoid(i_r + h_r)
            z = jax.nn.sigmoid(i_z + h_z)
            n = jnp.tanh(i_n + r * h_n)
            h = (1.0 - z) * n + z * h
            outs.append(h)
        x = jnp.stack(outs, axis=0)
        finals.append(h)
    return x, jnp.stack(finals, axis=0)


if __name__ == "__main__":
    # Small shapes consistent with the module's forward.
    SEQ, BATCH = 8, 2
    INPUT_SIZE, HIDDEN_SIZE, N_LAYERS = 16, 32, 2

    key = jax.random.PRNGKey(0)
    k_in, k_h, k_p = jax.random.split(key, 3)

    inputs = jax.random.normal(k_in, (SEQ, BATCH, INPUT_SIZE), dtype=jnp.float32)
    hidden = jax.random.normal(k_h, (N_LAYERS, BATCH, HIDDEN_SIZE), dtype=jnp.float32)

    # Deterministic parameter init: uniform(-1/sqrt(H), 1/sqrt(H)) like PyTorch.
    bound = 1.0 / (HIDDEN_SIZE ** 0.5)
    params = []
    pkeys = jax.random.split(k_p, N_LAYERS * 4)
    for l in range(N_LAYERS):
        in_dim = INPUT_SIZE if l == 0 else HIDDEN_SIZE
        kw1, kw2, kb1, kb2 = pkeys[4 * l:4 * l + 4]
        w_ih = jax.random.uniform(kw1, (3 * HIDDEN_SIZE, in_dim),
                                  minval=-bound, maxval=bound, dtype=jnp.float32)
        w_hh = jax.random.uniform(kw2, (3 * HIDDEN_SIZE, HIDDEN_SIZE),
                                  minval=-bound, maxval=bound, dtype=jnp.float32)
        b_ih = jax.random.uniform(kb1, (3 * HIDDEN_SIZE,),
                                  minval=-bound, maxval=bound, dtype=jnp.float32)
        b_hh = jax.random.uniform(kb2, (3 * HIDDEN_SIZE,),
                                  minval=-bound, maxval=bound, dtype=jnp.float32)
        params.append((w_ih, w_hh, b_ih, b_hh))

    rnn_fwd = jax.jit(rnn_forward)
    out, h_n = rnn_fwd(inputs, hidden, params)
    out = jax.block_until_ready(out)
    h_n = jax.block_until_ready(h_n)

    # Validate against pure-JAX reference.
    out_ref, h_ref = _gru_reference(inputs, hidden, params)
    assert out.shape == (SEQ, BATCH, HIDDEN_SIZE)
    assert h_n.shape == (N_LAYERS, BATCH, HIDDEN_SIZE)
    assert jnp.allclose(out, out_ref, atol=1e-4, rtol=1e-4)
    assert jnp.allclose(h_n, h_ref, atol=1e-4, rtol=1e-4)

    print("KERNEL_OK")
</pallas_src>

<mosaic_0001>
module attributes {stable_mosaic.version = 11 : i64} {
  func.func @_gru_seq_kernel(%arg0: i32, %arg1: i32, %arg2: memref<8x8x384xf32, #tpu.memory_space<vmem>>, %arg3: memref<8x128xf32, #tpu.memory_space<vmem>>, %arg4: memref<128x384xf32, #tpu.memory_space<vmem>>, %arg5: memref<1x128xf32, #tpu.memory_space<vmem>>, %arg6: memref<8x8x128xf32, #tpu.memory_space<vmem>>, %arg7: memref<8x128xf32, #tpu.memory_space<vmem>>) attributes {dimension_semantics = [#tpu.dimension_semantics<parallel>, #tpu.dimension_semantics<arbitrary>], iteration_bounds = array<i64: 1, 1>, scalar_prefetch = 0 : i64, scratch_operands = 1 : i64, tpu.core_type = #tpu.core_type<tc>, window_params = [{transform_indices = @transform_0, window_bounds = array<i64: 8, 8, 384>}, {transform_indices = @transform_1, window_bounds = array<i64: 8, 128>}, {pipeline_mode = #tpu.pipeline_mode<synchronous>, transform_indices = @transform_2, window_bounds = array<i64: 128, 384>}, {pipeline_mode = #tpu.pipeline_mode<synchronous>, transform_indices = @transform_3, window_bounds = array<i64: 1, 128>}, {transform_indices = @transform_4, window_bounds = array<i64: 8, 8, 128>}]} {
    %c0_i32 = arith.constant 0 : i32
    %0 = arith.cmpi eq, %arg1, %c0_i32 : i32
    %1 = arith.extui %0 : i1 to i32
    %c0_i32_0 = arith.constant 0 : i32
    %2 = arith.cmpi ne, %1, %c0_i32_0 : i32
    scf.if %2 {
      %c0_86 = arith.constant 0 : index
      %c0_87 = arith.constant 0 : index
      %296 = vector.load %arg3[%c0_86, %c0_87] : memref<8x128xf32, #tpu.memory_space<vmem>>, vector<8x128xf32>
      %c0_88 = arith.constant 0 : index
      %c0_89 = arith.constant 0 : index
      %297 = vector.load %arg7[%c0_88, %c0_89] : memref<8x128xf32, #tpu.memory_space<vmem>>, vector<8x128xf32>
      tpu.vector_store %arg7[%c0_88, %c0_89], %296 {strides = array<i32>} : memref<8x128xf32, #tpu.memory_space<vmem>>, vector<8x128xf32>,
    } else {
    }
    %c0 = arith.constant 0 : index
    %c0_1 = arith.constant 0 : index
    %3 = vector.load %arg5[%c0, %c0_1] : memref<1x128xf32, #tpu.memory_space<vmem>>, vector<1x128xf32>
    %4 = vector.shape_cast %3 : vector<1x128xf32> to vector<1x128xf32>
    %5 = vector.broadcast %4 : vector<1x128xf32> to vector<8x128xf32>
    %c0_2 = arith.constant 0 : index
    %c0_3 = arith.constant 0 : index
    %6 = vector.load %arg7[%c0_2, %c0_3] : memref<8x128xf32, #tpu.memory_space<vmem>>, vector<8x128xf32>
    %c0_i32_4 = arith.constant 0 : i32
    %7 = arith.index_cast %c0_i32_4 : i32 to index
    %c0_5 = arith.constant 0 : index
    %c0_6 = arith.constant 0 : index
    %8 = vector.load %arg2[%7, %c0_5, %c0_6] : memref<8x8x384xf32, #tpu.memory_space<vmem>>, vector<1x8x384xf32>
    %9 = vector.shape_cast %8 : vector<1x8x384xf32> to vector<8x384xf32>
    %c0_7 = arith.constant 0 : index
    %c0_8 = arith.constant 0 : index
    %10 = vector.load %arg4[%c0_7, %c0_8] : memref<128x384xf32, #tpu.memory_space<vmem>>, vector<128x384xf32>
    %cst = arith.constant dense<0.000000e+00> : vector<8x384xf32>
    %11 = tpu.matmul %6, %10, %cst {dimension_numbers = #tpu.dot_dimension_numbers<[1], [0], [0], [1], [0, 0, 1, 1], [], []>} : vector<8x128xf32>, vector<128x384xf32>, vector<8x384xf32> -> vector<8x384xf32>
    %12 = vector.extract_strided_slice %9 {offsets = [0, 0], sizes = [8, 128], strides = [1, 1]} : vector<8x384xf32> to vector<8x128xf32>
    %13 = vector.extract_strided_slice %11 {offsets = [0, 0], sizes = [8, 128], strides = [1, 1]} : vector<8x384xf32> to vector<8x128xf32>
    %14 = arith.addf %12, %13 : vector<8x128xf32>
    %15 = arith.negf %14 : vector<8x128xf32>
    %16 = math.exp %15 : vector<8x128xf32>
    %cst_9 = arith.constant 1.000000e+00 : f32
    %17 = vector.broadcast %cst_9 : f32 to vector<8x128xf32>
    %18 = arith.addf %17, %16 : vector<8x128xf32>
    %19 = arith.divf %17, %18 : vector<8x128xf32>
    %20 = vector.extract_strided_slice %9 {offsets = [0, 128], sizes = [8, 128], strides = [1, 1]} : vector<8x384xf32> to vector<8x128xf32>
    %21 = vector.extract_strided_slice %11 {offsets = [0, 128], sizes = [8, 128], strides = [1, 1]} : vector<8x384xf32> to vector<8x128xf32>
    %22 = arith.addf %20, %21 : vector<8x128xf32>
    %23 = arith.negf %22 : vector<8x128xf32>
    %24 = math.exp %23 : vector<8x128xf32>
    %cst_10 = arith.constant 1.000000e+00 : f32
    %25 = vector.broadcast %cst_10 : f32 to vector<8x128xf32>
    %26 = arith.addf %25, %24 : vector<8x128xf32>
    %27 = arith.divf %25, %26 : vector<8x128xf32>
    %28 = vector.extract_strided_slice %9 {offsets = [0, 256], sizes = [8, 128], strides = [1, 1]} : vector<8x384xf32> to vector<8x128xf32>
    %29 = vector.extract_strided_slice %11 {offsets = [0, 256], sizes = [8, 128], strides = [1, 1]} : vector<8x384xf32> to vector<8x128xf32>
    %30 = arith.addf %29, %5 : vector<8x128xf32>
    %31 = arith.mulf %19, %30 : vector<8x128xf32>
    %32 = arith.addf %28, %31 : vector<8x128xf32>
    %33 = math.tanh %32 : vector<8x128xf32>
    %cst_11 = arith.constant 1.000000e+00 : f32
    %34 = vector.broadcast %cst_11 : f32 to vector<8x128xf32>
    %35 = arith.subf %34, %27 : vector<8x128xf32>
    %36 = arith.mulf %35, %33 : vector<8x128xf32>
    %37 = arith.mulf %27, %6 : vector<8x128xf32>
    %38 = arith.addf %36, %37 : vector<8x128xf32>
    %39 = arith.index_cast %c0_i32_4 : i32 to index
    %c0_12 = arith.constant 0 : index
    %c0_13 = arith.constant 0 : index
    %40 = vector.load %arg6[%39, %c0_12, %c0_13] : memref<8x8x128xf32, #tpu.memory_space<vmem>>, vector<1x8x128xf32>
    %41 = vector.shape_cast %40 : vector<1x8x128xf32> to vector<8x128xf32>
    %42 = vector.shape_cast %38 : vector<8x128xf32> to vector<1x8x128xf32>
    tpu.vector_store %arg6[%39, %c0_12, %c0_13], %42 {strides = array<i32>} : memref<8x8x128xf32, #tpu.memory_space<vmem>>, vector<1x8x128xf32>,
    %c1_i32 = arith.constant 1 : i32
    %43 = arith.index_cast %c1_i32 : i32 to index
    %c0_14 = arith.constant 0 : index
    %c0_15 = arith.constant 0 : index
    %44 = vector.load %arg2[%43, %c0_14, %c0_15] : memref<8x8x384xf32, #tpu.memory_space<vmem>>, vector<1x8x384xf32>
    %45 = vector.shape_cast %44 : vector<1x8x384xf32> to vector<8x384xf32>
    %c0_16 = arith.constant 0 : index
    %c0_17 = arith.constant 0 : index
    %46 = vector.load %arg4[%c0_16, %c0_17] : memref<128x384xf32, #tpu.memory_space<vmem>>, vector<128x384xf32>
    %cst_18 = arith.constant dense<0.000000e+00> : vector<8x384xf32>
    %47 = tpu.matmul %38, %46, %cst_18 {dimension_numbers = #tpu.dot_dimension_numbers<[1], [0], [0], [1], [0, 0, 1, 1], [], []>} : vector<8x128xf32>, vector<128x384xf32>, vector<8x384xf32> -> vector<8x384xf32>
    %48 = vector.extract_strided_slice %45 {offsets = [0, 0], sizes = [8, 128], strides = [1, 1]} : vector<8x384xf32> to vector<8x128xf32>
    %49 = vector.extract_strided_slice %47 {offsets = [0, 0], sizes = [8, 128], strides = [1, 1]} : vector<8x384xf32> to vector<8x128xf32>
    %50 = arith.addf %48, %49 : vector<8x128xf32>
    %51 = arith.negf %50 : vector<8x128xf32>
    %52 = math.exp %51 : vector<8x128xf32>
    %cst_19 = arith.constant 1.000000e+00 : f32
    %53 = vector.broadcast %cst_19 : f32 to vector<8x128xf32>
    %54 = arith.addf %53, %52 : vector<8x128xf32>
    %55 = arith.divf %53, %54 : vector<8x128xf32>
    %56 = vector.extract_strided_slice %45 {offsets = [0, 128], sizes = [8, 128], strides = [1, 1]} : vector<8x384xf32> to vector<8x128xf32>
    %57 = vector.extract_strided_slice %47 {offsets = [0, 128], sizes = [8, 128], strides = [1, 1]} : vector<8x384xf32> to vector<8x128xf32>
    %58 = arith.addf %56, %57 : vector<8x128xf32>
    %59 = arith.negf %58 : vector<8x128xf32>
    %60 = math.exp %59 : vector<8x128xf32>
    %cst_20 = arith.constant 1.000000e+00 : f32
    %61 = vector.broadcast %cst_20 : f32 to vector<8x128xf32>
    %62 = arith.addf %61, %60 : vector<8x128xf32>
    %63 = arith.divf %61, %62 : vector<8x128xf32>
    %64 = vector.extract_strided_slice %45 {offsets = [0, 256], sizes = [8, 128], strides = [1, 1]} : vector<8x384xf32> to vector<8x128xf32>
    %65 = vector.extract_strided_slice %47 {offsets = [0, 256], sizes = [8, 128], strides = [1, 1]} : vector<8x384xf32> to vector<8x128xf32>
    %66 = arith.addf %65, %5 : vector<8x128xf32>
    %67 = arith.mulf %55, %66 : vector<8x128xf32>
    %68 = arith.addf %64, %67 : vector<8x128xf32>
    %69 = math.tanh %68 : vector<8x128xf32>
    %cst_21 = arith.constant 1.000000e+00 : f32
    %70 = vector.broadcast %cst_21 : f32 to vector<8x128xf32>
    %71 = arith.subf %70, %63 : vector<8x128xf32>
    %72 = arith.mulf %71, %69 : vector<8x128xf32>
    %73 = arith.mulf %63, %38 : vector<8x128xf32>
    %74 = arith.addf %72, %73 : vector<8x128xf32>
    %75 = arith.index_cast %c1_i32 : i32 to index
    %c0_22 = arith.constant 0 : index
    %c0_23 = arith.constant 0 : index
    %76 = vector.load %arg6[%75, %c0_22, %c0_23] : memref<8x8x128xf32, #tpu.memory_space<vmem>>, vector<1x8x128xf32>
    %77 = vector.shape_cast %76 : vector<1x8x128xf32> to vector<8x128xf32>
    %78 = vector.shape_cast %74 : vector<8x128xf32> to vector<1x8x128xf32>
    tpu.vector_store %arg6[%75, %c0_22, %c0_23], %78 {strides = array<i32>} : memref<8x8x128xf32, #tpu.memory_space<vmem>>, vector<1x8x128xf32>,
    %c2_i32 = arith.constant 2 : i32
    %79 = arith.index_cast %c2_i32 : i32 to index
    %c0_24 = arith.constant 0 : index
    %c0_25 = arith.constant 0 : index
    %80 = vector.load %arg2[%79, %c0_24, %c0_25] : memref<8x8x384xf32, #tpu.memory_space<vmem>>, vector<1x8x384xf32>
    %81 = vector.shape_cast %80 : vector<1x8x384xf32> to vector<8x384xf32>
    %c0_26 = arith.constant 0 : index
    %c0_27 = arith.constant 0 : index
    %82 = vector.load %arg4[%c0_26, %c0_27] : memref<128x384xf32, #tpu.memory_space<vmem>>, vector<128x384xf32>
    %cst_28 = arith.constant dense<0.000000e+00> : vector<8x384xf32>
    %83 = tpu.matmul %74, %82, %cst_28 {dimension_numbers = #tpu.dot_dimension_numbers<[1], [0], [0], [1], [0, 0, 1, 1], [], []>} : vector<8x128xf32>, vector<128x384xf32>, vector<8x384xf32> -> vector<8x384xf32>
    %84 = vector.extract_strided_slice %81 {offsets = [0, 0], sizes = [8, 128], strides = [1, 1]} : vector<8x384xf32> to vector<8x128xf32>
    %85 = vector.extract_strided_slice %83 {offsets = [0, 0], sizes = [8, 128], strides = [1, 1]} : vector<8x384xf32> to vector<8x128xf32>
    %86 = arith.addf %84, %85 : vector<8x128xf32>
    %87 = arith.negf %86 : vector<8x128xf32>
    %88 = math.exp %87 : vector<8x128xf32>
    %cst_29 = arith.constant 1.000000e+00 : f32
    %89 = vector.broadcast %cst_29 : f32 to vector<8x128xf32>
    %90 = arith.addf %89, %88 : vector<8x128xf32>
    %91 = arith.divf %89, %90 : vector<8x128xf32>
    %92 = vector.extract_strided_slice %81 {offsets = [0, 128], sizes = [8, 128], strides = [1, 1]} : vector<8x384xf32> to vector<8x128xf32>
    %93 = vector.extract_strided_slice %83 {offsets = [0, 128], sizes = [8, 128], strides = [1, 1]} : vector<8x384xf32> to vector<8x128xf32>
    %94 = arith.addf %92, %93 : vector<8x128xf32>
    %95 = arith.negf %94 : vector<8x128xf32>
    %96 = math.exp %95 : vector<8x128xf32>
    %cst_30 = arith.constant 1.000000e+00 : f32
    %97 = vector.broadcast %cst_30 : f32 to vector<8x128xf32>
    %98 = arith.addf %97, %96 : vector<8x128xf32>
    %99 = arith.divf %97, %98 : vector<8x128xf32>
    %100 = vector.extract_strided_slice %81 {offsets = [0, 256], sizes = [8, 128], strides = [1, 1]} : vector<8x384xf32> to vector<8x128xf32>
    %101 = vector.extract_strided_slice %83 {offsets = [0, 256], sizes = [8, 128], strides = [1, 1]} : vector<8x384xf32> to vector<8x128xf32>
    %102 = arith.addf %101, %5 : vector<8x128xf32>
    %103 = arith.mulf %91, %102 : vector<8x128xf32>
    %104 = arith.addf %100, %103 : vector<8x128xf32>
    %105 = math.tanh %104 : vector<8x128xf32>
    %cst_31 = arith.constant 1.000000e+00 : f32
    %106 = vector.broadcast %cst_31 : f32 to vector<8x128xf32>
    %107 = arith.subf %106, %99 : vector<8x128xf32>
    %108 = arith.mulf %107, %105 : vector<8x128xf32>
    %109 = arith.mulf %99, %74 : vector<8x128xf32>
    %110 = arith.addf %108, %109 : vector<8x128xf32>
    %111 = arith.index_cast %c2_i32 : i32 to index
    %c0_32 = arith.constant 0 : index
    %c0_33 = arith.constant 0 : index
    %112 = vector.load %arg6[%111, %c0_32, %c0_33] : memref<8x8x128xf32, #tpu.memory_space<vmem>>, vector<1x8x128xf32>
    %113 = vector.shape_cast %112 : vector<1x8x128xf32> to vector<8x128xf32>
    %114 = vector.shape_cast %110 : vector<8x128xf32> to vector<1x8x128xf32>
    tpu.vector_store %arg6[%111, %c0_32, %c0_33], %114 {strides = array<i32>} : memref<8x8x128xf32, #tpu.memory_space<vmem>>, vector<1x8x128xf32>,
    %c3_i32 = arith.constant 3 : i32
    %115 = arith.index_cast %c3_i32 : i32 to index
    %c0_34 = arith.constant 0 : index
    %c0_35 = arith.constant 0 : index
    %116 = vector.load %arg2[%115, %c0_34, %c0_35] : memref<8x8x384xf32, #tpu.memory_space<vmem>>, vector<1x8x384xf32>
    %117 = vector.shape_cast %116 : vector<1x8x384xf32> to vector<8x384xf32>
    %c0_36 = arith.constant 0 : index
    %c0_37 = arith.constant 0 : index
    %118 = vector.load %arg4[%c0_36, %c0_37] : memref<128x384xf32, #tpu.memory_space<vmem>>, vector<128x384xf32>
    %cst_38 = arith.constant dense<0.000000e+00> : vector<8x384xf32>
    %119 = tpu.matmul %110, %118, %cst_38 {dimension_numbers = #tpu.dot_dimension_numbers<[1], [0], [0], [1], [0, 0, 1, 1], [], []>} : vector<8x128xf32>, vector<128x384xf32>, vector<8x384xf32> -> vector<8x384xf32>
    %120 = vector.extract_strided_slice %117 {offsets = [0, 0], sizes = [8, 128], strides = [1, 1]} : vector<8x384xf32> to vector<8x128xf32>
    %121 = vector.extract_strided_slice %119 {offsets = [0, 0], sizes = [8, 128], strides = [1, 1]} : vector<8x384xf32> to vector<8x128xf32>
    %122 = arith.addf %120, %121 : vector<8x128xf32>
    %123 = arith.negf %122 : vector<8x128xf32>
    %124 = math.exp %123 : vector<8x128xf32>
    %cst_39 = arith.constant 1.000000e+00 : f32
    %125 = vector.broadcast %cst_39 : f32 to vector<8x128xf32>
    %126 = arith.addf %125, %124 : vector<8x128xf32>
    %127 = arith.divf %125, %126 : vector<8x128xf32>
    %128 = vector.extract_strided_slice %117 {offsets = [0, 128], sizes = [8, 128], strides = [1, 1]} : vector<8x384xf32> to vector<8x128xf32>
    %129 = vector.extract_strided_slice %119 {offsets = [0, 128], sizes = [8, 128], strides = [1, 1]} : vector<8x384xf32> to vector<8x128xf32>
    %130 = arith.addf %128, %129 : vector<8x128xf32>
    %131 = arith.negf %130 : vector<8x128xf32>
    %132 = math.exp %131 : vector<8x128xf32>
    %cst_40 = arith.constant 1.000000e+00 : f32
    %133 = vector.broadcast %cst_40 : f32 to vector<8x128xf32>
    %134 = arith.addf %133, %132 : vector<8x128xf32>
    %135 = arith.divf %133, %134 : vector<8x128xf32>
    %136 = vector.extract_strided_slice %117 {offsets = [0, 256], sizes = [8, 128], strides = [1, 1]} : vector<8x384xf32> to vector<8x128xf32>
    %137 = vector.extract_strided_slice %119 {offsets = [0, 256], sizes = [8, 128], strides = [1, 1]} : vector<8x384xf32> to vector<8x128xf32>
    %138 = arith.addf %137, %5 : vector<8x128xf32>
    %139 = arith.mulf %127, %138 : vector<8x128xf32>
    %140 = arith.addf %136, %139 : vector<8x128xf32>
    %141 = math.tanh %140 : vector<8x128xf32>
    %cst_41 = arith.constant 1.000000e+00 : f32
    %142 = vector.broadcast %cst_41 : f32 to vector<8x128xf32>
    %143 = arith.subf %142, %135 : vector<8x128xf32>
    %144 = arith.mulf %143, %141 : vector<8x128xf32>
    %145 = arith.mulf %135, %110 : vector<8x128xf32>
    %146 = arith.addf %144, %145 : vector<8x128xf32>
    %147 = arith.index_cast %c3_i32 : i32 to index
    %c0_42 = arith.constant 0 : index
    %c0_43 = arith.constant 0 : index
    %148 = vector.load %arg6[%147, %c0_42, %c0_43] : memref<8x8x128xf32, #tpu.memory_space<vmem>>, vector<1x8x128xf32>
    %149 = vector.shape_cast %148 : vector<1x8x128xf32> to vector<8x128xf32>
    %150 = vector.shape_cast %146 : vector<8x128xf32> to vector<1x8x128xf32>
    tpu.vector_store %arg6[%147, %c0_42, %c0_43], %150 {strides = array<i32>} : memref<8x8x128xf32, #tpu.memory_space<vmem>>, vector<1x8x128xf32>,
    %c4_i32 = arith.constant 4 : i32
    %151 = arith.index_cast %c4_i32 : i32 to index
    %c0_44 = arith.constant 0 : index
    %c0_45 = arith.constant 0 : index
    %152 = vector.load %arg2[%151, %c0_44, %c0_45] : memref<8x8x384xf32, #tpu.memory_space<vmem>>, vector<1x8x384xf32>
    %153 = vector.shape_cast %152 : vector<1x8x384xf32> to vector<8x384xf32>
    %c0_46 = arith.constant 0 : index
    %c0_47 = arith.constant 0 : index
    %154 = vector.load %arg4[%c0_46, %c0_47] : memref<128x384xf32, #tpu.memory_space<vmem>>, vector<128x384xf32>
    %cst_48 = arith.constant dense<0.000000e+00> : vector<8x384xf32>
    %155 = tpu.matmul %146, %154, %cst_48 {dimension_numbers = #tpu.dot_dimension_numbers<[1], [0], [0], [1], [0, 0, 1, 1], [], []>} : vector<8x128xf32>, vector<128x384xf32>, vector<8x384xf32> -> vector<8x384xf32>
    %156 = vector.extract_strided_slice %153 {offsets = [0, 0], sizes = [8, 128], strides = [1, 1]} : vector<8x384xf32> to vector<8x128xf32>
    %157 = vector.extract_strided_slice %155 {offsets = [0, 0], sizes = [8, 128], strides = [1, 1]} : vector<8x384xf32> to vector<8x128xf32>
    %158 = arith.addf %156, %157 : vector<8x128xf32>
    %159 = arith.negf %158 : vector<8x128xf32>
    %160 = math.exp %159 : vector<8x128xf32>
    %cst_49 = arith.constant 1.000000e+00 : f32
    %161 = vector.broadcast %cst_49 : f32 to vector<8x128xf32>
    %162 = arith.addf %161, %160 : vector<8x128xf32>
    %163 = arith.divf %161, %162 : vector<8x128xf32>
    %164 = vector.extract_strided_slice %153 {offsets = [0, 128], sizes = [8, 128], strides = [1, 1]} : vector<8x384xf32> to vector<8x128xf32>
    %165 = vector.extract_strided_slice %155 {offsets = [0, 128], sizes = [8, 128], strides = [1, 1]} : vector<8x384xf32> to vector<8x128xf32>
    %166 = arith.addf %164, %165 : vector<8x128xf32>
    %167 = arith.negf %166 : vector<8x128xf32>
    %168 = math.exp %167 : vector<8x128xf32>
    %cst_50 = arith.constant 1.000000e+00 : f32
    %169 = vector.broadcast %cst_50 : f32 to vector<8x128xf32>
    %170 = arith.addf %169, %168 : vector<8x128xf32>
    %171 = arith.divf %169, %170 : vector<8x128xf32>
    %172 = vector.extract_strided_slice %153 {offsets = [0, 256], sizes = [8, 128], strides = [1, 1]} : vector<8x384xf32> to vector<8x128xf32>
    %173 = vector.extract_strided_slice %155 {offsets = [0, 256], sizes = [8, 128], strides = [1, 1]} : vector<8x384xf32> to vector<8x128xf32>
    %174 = arith.addf %173, %5 : vector<8x128xf32>
    %175 = arith.mulf %163, %174 : vector<8x128xf32>
    %176 = arith.addf %172, %175 : vector<8x128xf32>
    %177 = math.tanh %176 : vector<8x128xf32>
    %cst_51 = arith.constant 1.000000e+00 : f32
    %178 = vector.broadcast %cst_51 : f32 to vector<8x128xf32>
    %179 = arith.subf %178, %171 : vector<8x128xf32>
    %180 = arith.mulf %179, %177 : vector<8x128xf32>
    %181 = arith.mulf %171, %146 : vector<8x128xf32>
    %182 = arith.addf %180, %181 : vector<8x128xf32>
    %183 = arith.index_cast %c4_i32 : i32 to index
    %c0_52 = arith.constant 0 : index
    %c0_53 = arith.constant 0 : index
    %184 = vector.load %arg6[%183, %c0_52, %c0_53] : memref<8x8x128xf32, #tpu.memory_space<vmem>>, vector<1x8x128xf32>
    %185 = vector.shape_cast %184 : vector<1x8x128xf32> to vector<8x128xf32>
    %186 = vector.shape_cast %182 : vector<8x128xf32> to vector<1x8x128xf32>
    tpu.vector_store %arg6[%183, %c0_52, %c0_53], %186 {strides = array<i32>} : memref<8x8x128xf32, #tpu.memory_space<vmem>>, vector<1x8x128xf32>,
    %c5_i32 = arith.constant 5 : i32
    %187 = arith.index_cast %c5_i32 : i32 to index
    %c0_54 = arith.constant 0 : index
    %c0_55 = arith.constant 0 : index
    %188 = vector.load %arg2[%187, %c0_54, %c0_55] : memref<8x8x384xf32, #tpu.memory_space<vmem>>, vector<1x8x384xf32>
    %189 = vector.shape_cast %188 : vector<1x8x384xf32> to vector<8x384xf32>
    %c0_56 = arith.constant 0 : index
    %c0_57 = arith.constant 0 : index
    %190 = vector.load %arg4[%c0_56, %c0_57] : memref<128x384xf32, #tpu.memory_space<vmem>>, vector<128x384xf32>
    %cst_58 = arith.constant dense<0.000000e+00> : vector<8x384xf32>
    %191 = tpu.matmul %182, %190, %cst_58 {dimension_numbers = #tpu.dot_dimension_numbers<[1], [0], [0], [1], [0, 0, 1, 1], [], []>} : vector<8x128xf32>, vector<128x384xf32>, vector<8x384xf32> -> vector<8x384xf32>
    %192 = vector.extract_strided_slice %189 {offsets = [0, 0], sizes = [8, 128], strides = [1, 1]} : vector<8x384xf32> to vector<8x128xf32>
    %193 = vector.extract_strided_slice %191 {offsets = [0, 0], sizes = [8, 128], strides = [1, 1]} : vector<8x384xf32> to vector<8x128xf32>
    %194 = arith.addf %192, %193 : vector<8x128xf32>
    %195 = arith.negf %194 : vector<8x128xf32>
    %196 = math.exp %195 : vector<8x128xf32>
    %cst_59 = arith.constant 1.000000e+00 : f32
    %197 = vector.broadcast %cst_59 : f32 to vector<8x128xf32>
    %198 = arith.addf %197, %196 : vector<8x128xf32>
    %199 = arith.divf %197, %198 : vector<8x128xf32>
    %200 = vector.extract_strided_slice %189 {offsets = [0, 128], sizes = [8, 128], strides = [1, 1]} : vector<8x384xf32> to vector<8x128xf32>
    %201 = vector.extract_strided_slice %191 {offsets = [0, 128], sizes = [8, 128], strides = [1, 1]} : vector<8x384xf32> to vector<8x128xf32>
    %202 = arith.addf %200, %201 : vector<8x128xf32>
    %203 = arith.negf %202 : vector<8x128xf32>
    %204 = math.exp %203 : vector<8x128xf32>
    %cst_60 = arith.constant 1.000000e+00 : f32
    %205 = vector.broadcast %cst_60 : f32 to vector<8x128xf32>
    %206 = arith.addf %205, %204 : vector<8x128xf32>
    %207 = arith.divf %205, %206 : vector<8x128xf32>
    %208 = vector.extract_strided_slice %189 {offsets = [0, 256], sizes = [8, 128], strides = [1, 1]} : vector<8x384xf32> to vector<8x128xf32>
    %209 = vector.extract_strided_slice %191 {offsets = [0, 256], sizes = [8, 128], strides = [1, 1]} : vector<8x384xf32> to vector<8x128xf32>
    %210 = arith.addf %209, %5 : vector<8x128xf32>
    %211 = arith.mulf %199, %210 : vector<8x128xf32>
    %212 = arith.addf %208, %211 : vector<8x128xf32>
    %213 = math.tanh %212 : vector<8x128xf32>
    %cst_61 = arith.constant 1.000000e+00 : f32
    %214 = vector.broadcast %cst_61 : f32 to vector<8x128xf32>
    %215 = arith.subf %214, %207 : vector<8x128xf32>
    %216 = arith.mulf %215, %213 : vector<8x128xf32>
    %217 = arith.mulf %207, %182 : vector<8x128xf32>
    %218 = arith.addf %216, %217 : vector<8x128xf32>
    %219 = arith.index_cast %c5_i32 : i32 to index
    %c0_62 = arith.constant 0 : index
    %c0_63 = arith.constant 0 : index
    %220 = vector.load %arg6[%219, %c0_62, %c0_63] : memref<8x8x128xf32, #tpu.memory_space<vmem>>, vector<1x8x128xf32>
    %221 = vector.shape_cast %220 : vector<1x8x128xf32> to vector<8x128xf32>
    %222 = vector.shape_cast %218 : vector<8x128xf32> to vector<1x8x128xf32>
    tpu.vector_store %arg6[%219, %c0_62, %c0_63], %222 {strides = array<i32>} : memref<8x8x128xf32, #tpu.memory_space<vmem>>, vector<1x8x128xf32>,
    %c6_i32 = arith.constant 6 : i32
    %223 = arith.index_cast %c6_i32 : i32 to index
    %c0_64 = arith.constant 0 : index
    %c0_65 = arith.constant 0 : index
    %224 = vector.load %arg2[%223, %c0_64, %c0_65] : memref<8x8x384xf32, #tpu.memory_space<vmem>>, vector<1x8x384xf32>
    %225 = vector.shape_cast %224 : vector<1x8x384xf32> to vector<8x384xf32>
    %c0_66 = arith.constant 0 : index
    %c0_67 = arith.constant 0 : index
    %226 = vector.load %arg4[%c0_66, %c0_67] : memref<128x384xf32, #tpu.memory_space<vmem>>, vector<128x384xf32>
    %cst_68 = arith.constant dense<0.000000e+00> : vector<8x384xf32>
    %227 = tpu.matmul %218, %226, %cst_68 {dimension_numbers = #tpu.dot_dimension_numbers<[1], [0], [0], [1], [0, 0, 1, 1], [], []>} : vector<8x128xf32>, vector<128x384xf32>, vector<8x384xf32> -> vector<8x384xf32>
    %228 = vector.extract_strided_slice %225 {offsets = [0, 0], sizes = [8, 128], strides = [1, 1]} : vector<8x384xf32> to vector<8x128xf32>
    %229 = vector.extract_strided_slice %227 {offsets = [0, 0], sizes = [8, 128], strides = [1, 1]} : vector<8x384xf32> to vector<8x128xf32>
    %230 = arith.addf %228, %229 : vector<8x128xf32>
    %231 = arith.negf %230 : vector<8x128xf32>
    %232 = math.exp %231 : vector<8x128xf32>
    %cst_69 = arith.constant 1.000000e+00 : f32
    %233 = vector.broadcast %cst_69 : f32 to vector<8x128xf32>
    %234 = arith.addf %233, %232 : vector<8x128xf32>
    %235 = arith.divf %233, %234 : vector<8x128xf32>
    %236 = vector.extract_strided_slice %225 {offsets = [0, 128], sizes = [8, 128], strides = [1, 1]} : vector<8x384xf32> to vector<8x128xf32>
    %237 = vector.extract_strided_slice %227 {offsets = [0, 128], sizes = [8, 128], strides = [1, 1]} : vector<8x384xf32> to vector<8x128xf32>
    %238 = arith.addf %236, %237 : vector<8x128xf32>
    %239 = arith.negf %238 : vector<8x128xf32>
    %240 = math.exp %239 : vector<8x128xf32>
    %cst_70 = arith.constant 1.000000e+00 : f32
    %241 = vector.broadcast %cst_70 : f32 to vector<8x128xf32>
    %242 = arith.addf %241, %240 : vector<8x128xf32>
    %243 = arith.divf %241, %242 : vector<8x128xf32>
    %244 = vector.extract_strided_slice %225 {offsets = [0, 256], sizes = [8, 128], strides = [1, 1]} : vector<8x384xf32> to vector<8x128xf32>
    %245 = vector.extract_strided_slice %227 {offsets = [0, 256], sizes = [8, 128], strides = [1, 1]} : vector<8x384xf32> to vector<8x128xf32>
    %246 = arith.addf %245, %5 : vector<8x128xf32>
    %247 = arith.mulf %235, %246 : vector<8x128xf32>
    %248 = arith.addf %244, %247 : vector<8x128xf32>
    %249 = math.tanh %248 : vector<8x128xf32>
    %cst_71 = arith.constant 1.000000e+00 : f32
    %250 = vector.broadcast %cst_71 : f32 to vector<8x128xf32>
    %251 = arith.subf %250, %243 : vector<8x128xf32>
    %252 = arith.mulf %251, %249 : vector<8x128xf32>
    %253 = arith.mulf %243, %218 : vector<8x128xf32>
    %254 = arith.addf %252, %253 : vector<8x128xf32>
    %255 = arith.index_cast %c6_i32 : i32 to index
    %c0_72 = arith.constant 0 : index
    %c0_73 = arith.constant 0 : index
    %256 = vector.load %arg6[%255, %c0_72, %c0_73] : memref<8x8x128xf32, #tpu.memory_space<vmem>>, vector<1x8x128xf32>
    %257 = vector.shape_cast %256 : vector<1x8x128xf32> to vector<8x128xf32>
    %258 = vector.shape_cast %254 : vector<8x128xf32> to vector<1x8x128xf32>
    tpu.vector_store %arg6[%255, %c0_72, %c0_73], %258 {strides = array<i32>} : memref<8x8x128xf32, #tpu.memory_space<vmem>>, vector<1x8x128xf32>,
    %c7_i32 = arith.constant 7 : i32
    %259 = arith.index_cast %c7_i32 : i32 to index
    %c0_74 = arith.constant 0 : index
    %c0_75 = arith.constant 0 : index
    %260 = vector.load %arg2[%259, %c0_74, %c0_75] : memref<8x8x384xf32, #tpu.memory_space<vmem>>, vector<1x8x384xf32>
    %261 = vector.shape_cast %260 : vector<1x8x384xf32> to vector<8x384xf32>
    %c0_76 = arith.constant 0 : index
    %c0_77 = arith.constant 0 : index
    %262 = vector.load %arg4[%c0_76, %c0_77] : memref<128x384xf32, #tpu.memory_space<vmem>>, vector<128x384xf32>
    %cst_78 = arith.constant dense<0.000000e+00> : vector<8x384xf32>
    %263 = tpu.matmul %254, %262, %cst_78 {dimension_numbers = #tpu.dot_dimension_numbers<[1], [0], [0], [1], [0, 0, 1, 1], [], []>} : vector<8x128xf32>, vector<128x384xf32>, vector<8x384xf32> -> vector<8x384xf32>
    %264 = vector.extract_strided_slice %261 {offsets = [0, 0], sizes = [8, 128], strides = [1, 1]} : vector<8x384xf32> to vector<8x128xf32>
    %265 = vector.extract_strided_slice %263 {offsets = [0, 0], sizes = [8, 128], strides = [1, 1]} : vector<8x384xf32> to vector<8x128xf32>
    %266 = arith.addf %264, %265 : vector<8x128xf32>
    %267 = arith.negf %266 : vector<8x128xf32>
    %268 = math.exp %267 : vector<8x128xf32>
    %cst_79 = arith.constant 1.000000e+00 : f32
    %269 = vector.broadcast %cst_79 : f32 to vector<8x128xf32>
    %270 = arith.addf %269, %268 : vector<8x128xf32>
    %271 = arith.divf %269, %270 : vector<8x128xf32>
    %272 = vector.extract_strided_slice %261 {offsets = [0, 128], sizes = [8, 128], strides = [1, 1]} : vector<8x384xf32> to vector<8x128xf32>
    %273 = vector.extract_strided_slice %263 {offsets = [0, 128], sizes = [8, 128], strides = [1, 1]} : vector<8x384xf32> to vector<8x128xf32>
    %274 = arith.addf %272, %273 : vector<8x128xf32>
    %275 = arith.negf %274 : vector<8x128xf32>
    %276 = math.exp %275 : vector<8x128xf32>
    %cst_80 = arith.constant 1.000000e+00 : f32
    %277 = vector.broadcast %cst_80 : f32 to vector<8x128xf32>
    %278 = arith.addf %277, %276 : vector<8x128xf32>
    %279 = arith.divf %277, %278 : vector<8x128xf32>
    %280 = vector.extract_strided_slice %261 {offsets = [0, 256], sizes = [8, 128], strides = [1, 1]} : vector<8x384xf32> to vector<8x128xf32>
    %281 = vector.extract_strided_slice %263 {offsets = [0, 256], sizes = [8, 128], strides = [1, 1]} : vector<8x384xf32> to vector<8x128xf32>
    %282 = arith.addf %281, %5 : vector<8x128xf32>
    %283 = arith.mulf %271, %282 : vector<8x128xf32>
    %284 = arith.addf %280, %283 : vector<8x128xf32>
    %285 = math.tanh %284 : vector<8x128xf32>
    %cst_81 = arith.constant 1.000000e+00 : f32
    %286 = vector.broadcast %cst_81 : f32 to vector<8x128xf32>
    %287 = arith.subf %286, %279 : vector<8x128xf32>
    %288 = arith.mulf %287, %285 : vector<8x128xf32>
    %289 = arith.mulf %279, %254 : vector<8x128xf32>
    %290 = arith.addf %288, %289 : vector<8x128xf32>
    %291 = arith.index_cast %c7_i32 : i32 to index
    %c0_82 = arith.constant 0 : index
    %c0_83 = arith.constant 0 : index
    %292 = vector.load %arg6[%291, %c0_82, %c0_83] : memref<8x8x128xf32, #tpu.memory_space<vmem>>, vector<1x8x128xf32>
    %293 = vector.shape_cast %292 : vector<1x8x128xf32> to vector<8x128xf32>
    %294 = vector.shape_cast %290 : vector<8x128xf32> to vector<1x8x128xf32>
    tpu.vector_store %arg6[%291, %c0_82, %c0_83], %294 {strides = array<i32>} : memref<8x8x128xf32, #tpu.memory_space<vmem>>, vector<1x8x128xf32>,
    %c8_i32 = arith.constant 8 : i32
    %c0_84 = arith.constant 0 : index
    %c0_85 = arith.constant 0 : index
    %295 = vector.load %arg7[%c0_84, %c0_85] : memref<8x128xf32, #tpu.memory_space<vmem>>, vector<8x128xf32>
    tpu.vector_store %arg7[%c0_84, %c0_85], %290 {strides = array<i32>} : memref<8x128xf32, #tpu.memory_space<vmem>>, vector<8x128xf32>,
    return
  }
  func.func @transform_0(%arg0: i32, %arg1: i32) -> (i32, i32, i32) {
    %c0_i32 = arith.constant 0 : i32
    %c0_i32_0 = arith.constant 0 : i32
    return %arg1, %arg0, %c0_i32 : i32, i32, i32
  }
  func.func @transform_1(%arg0: i32, %arg1: i32) -> (i32, i32) {
    %c0_i32 = arith.constant 0 : i32
    %c0_i32_0 = arith.constant 0 : i32
    return %arg0, %c0_i32 : i32, i32
  }
  func.func @transform_2(%arg0: i32, %arg1: i32) -> (i32, i32) {
    %c0_i32 = arith.constant 0 : i32
    %c0_i32_0 = arith.constant 0 : i32
    %c0_i32_1 = arith.constant 0 : i32
    return %c0_i32, %c0_i32_0 : i32, i32
  }
  func.func @transform_3(%arg0: i32, %arg1: i32) -> (i32, i32) {
    %c0_i32 = arith.constant 0 : i32
    %c0_i32_0 = arith.constant 0 : i32
    %c0_i32_1 = arith.constant 0 : i32
    return %c0_i32, %c0_i32_0 : i32, i32
  }
  func.func @transform_4(%arg0: i32, %arg1: i32) -> (i32, i32, i32) {
    %c0_i32 = arith.constant 0 : i32
    %c0_i32_0 = arith.constant 0 : i32
    return %arg1, %arg0, %c0_i32 : i32, i32, i32
  }
}

</mosaic_0001>

<bundles_post_ra>
// kernel: rnn_forward.2
= control target key start
LH: loop header
LB: loop body
LE: loop exit
PB: predicated region body
PF: predicated region fallthrough
CT: control target
= control target key end

     0   :  { %s2500_s2 = inlined_call_operand.vmem [shape: f32[128,384], index: 2, kind: input, shape index: {}]   ;;  %s2501_s1 = inlined_call_operand.vmem [shape: f32[8,128], index: 1, kind: input, shape index: {}]   ;;  %s2502_s3 = inlined_call_operand.vmem [shape: f32[1,128], index: 3, kind: input, shape index: {}]   ;;  %s2503_s0 = inlined_call_operand.vmem [shape: f32[8,8,384], index: 0, kind: input, shape index: {}]   ;;  %s2504_s4 = inlined_call_operand.vmem [shape: f32[8,8,128], index: 4, kind: output, shape index: {}]  }
   0x1   :  { %v1481_v0 = vld [vmem:[%s2500_s2 + $0x168] sm:$0xff]  ;;  %v1486_v1 = vld [vmem:[%s2500_s2 + $0x170] sm:$0xff]  ;;  %v1498_v3 = vld [vmem:[%s2500_s2 + $0x158] sm:$0xff] }
   0x2   :  { %v1491_v2 = vld [vmem:[%s2500_s2 + $0x150] sm:$0xff]  ;;  %79 = vmatpush.msra.mxu0 %v1481_v0  ;;  %99 = vmatpush.msra.mxu1 %v1486_v1  ;;  %v1503_v4 = vld [vmem:[%s2500_s2 + $0x138] sm:$0xff]  ;;  %v1508_v5 = vld [vmem:[%s2500_s2 + $0x140] sm:$0xff] }
   0x3   :  { %240 = vmatpush.msra.mxu3 %v1481_v0  ;;  %v1516_v6 = vld [vmem:[%s2500_s2 + $0x120] sm:$0xff]  ;;  %v1521_v7 = vld [vmem:[%s2500_s2 + $0x128] sm:$0xff]  ;;  %v1534_v9 = vld [vmem:[%s2500_s2 + $0x110] sm:$0xff] }
   0x4   :  { %80 = vmatpush.msra.mxu0 %v1491_v2  ;;  %100 = vmatpush.msra.mxu1 %v1498_v3  ;;  %v1529_v8 = vld [vmem:[%s2500_s2 + $0x108] sm:$0xff]  ;;  %v1542_v10 = vld [vmem:[%s2500_s2 + $0xf0] sm:$0xff]  ;;  %v1547_v11 = vld [vmem:[%s2500_s2 + $0xf8] sm:$0xff] }
   0x5   :  { %241 = vmatpush.msra.mxu3 %v1491_v2  ;;  %v1552_v12 = vld [vmem:[%s2500_s2 + $0x178] sm:$0xff]  ;;  %v1560_v13 = vld [vmem:[%s2500_s2 + $0x160] sm:$0xff]  ;;  %v1579_v16 = vld [vmem:[%s2500_s2 + $0x148] sm:$0xff] }
   0x6   :  { %81 = vmatpush.msra.mxu0 %v1503_v4  ;;  %101 = vmatpush.msra.mxu1 %v1508_v5  ;;  %v1565_v14 = vld [vmem:[%s2500_s2 + $0xd8] sm:$0xff]  ;;  %v1570_v15 = vld [vmem:[%s2500_s2 + $0xe0] sm:$0xff]  ;;  %v1589_v18 = vld [vmem:[%s2500_s2 + $0xc8] sm:$0xff] }
   0x7   :  { %242 = vmatpush.msra.mxu3 %v1503_v4  ;;  %119 = vmatpush.msra.mxu2 %v1552_v12  ;;  %v1584_v17 = vld [vmem:[%s2500_s2 + $0xc0] sm:$0xff]  ;;  %v1598_v19 = vld [vmem:[%s2500_s2 + $0x130] sm:$0xff]  ;;  %v1603_v20 = vld [vmem:[%s2500_s2 + $0xa8] sm:$0xff] }
   0x8   :  { %82 = vmatpush.msra.mxu0 %v1516_v6  ;;  %102 = vmatpush.msra.mxu1 %v1521_v7  ;;  %v1608_v21 = vld [vmem:[%s2500_s2 + $0xb0] sm:$0xff]  ;;  %v1617_v22 = vld [vmem:[%s2500_s2 + $0x118] sm:$0xff]  ;;  %v1636_v25 = vld [vmem:[%s2500_s2 + $0x100] sm:$0xff] }
   0x9   :  { %243 = vmatpush.msra.mxu3 %v1516_v6  ;;  %120 = vmatpush.msra.mxu2 %v1560_v13  ;;  %v1622_v23 = vld [vmem:[%s2500_s2 + $0x90] sm:$0xff]  ;;  %v1627_v24 = vld [vmem:[%s2500_s2 + $0x98] sm:$0xff]  ;;  %v1646_v27 = vld [vmem:[%s2500_s2 + $0x80] sm:$0xff] }
   0xa   :  { %83 = vmatpush.msra.mxu0 %v1529_v8  ;;  %103 = vmatpush.msra.mxu1 %v1534_v9  ;;  %v1641_v26 = vld [vmem:[%s2500_s2 + $0x78] sm:$0xff]  ;;  %v1655_v28 = vld [vmem:[%s2500_s2 + $0xe8] sm:$0xff]  ;;  %v1660_v29 = vld [vmem:[%s2500_s2 + $0x60] sm:$0xff] }
   0xb   :  { %244 = vmatpush.msra.mxu3 %v1529_v8  ;;  %121 = vmatpush.msra.mxu2 %v1579_v16  ;;  %v1665_v30 = vld [vmem:[%s2500_s2 + $0x68] sm:$0xff]  ;;  %v1674_v31 = vld [vmem:[%s2500_s2 + $0xd0] sm:$0xff]  ;;  %v1693_v34 = vld [vmem:[%s2500_s2 + $0xb8] sm:$0xff] }
   0xc   :  { %84 = vmatpush.msra.mxu0 %v1542_v10  ;;  %104 = vmatpush.msra.mxu1 %v1547_v11  ;;  %v1679_v32 = vld [vmem:[%s2500_s2 + $0x48] sm:$0xff]  ;;  %v1684_v33 = vld [vmem:[%s2500_s2 + $0x50] sm:$0xff]  ;;  %v1703_v36 = vld [vmem:[%s2500_s2 + $0x38] sm:$0xff] }
   0xd   :  { %245 = vmatpush.msra.mxu3 %v1542_v10  ;;  %122 = vmatpush.msra.mxu2 %v1598_v19  ;;  %v1698_v35 = vld [vmem:[%s2500_s2 + $0x30] sm:$0xff]  ;;  %v1712_v37 = vld [vmem:[%s2500_s2 + $0xa0] sm:$0xff]  ;;  %v1717_v38 = vld [vmem:[%s2500_s2 + $0x18] sm:$0xff] }
   0xe   :  { %85 = vmatpush.msra.mxu0 %v1565_v14  ;;  %105 = vmatpush.msra.mxu1 %v1570_v15  ;;  %v1722_v39 = vld [vmem:[%s2500_s2 + $0x20] sm:$0xff]  ;;  %v1731_v40 = vld [vmem:[%s2500_s2 + $0x88] sm:$0xff]  ;;  %v1756_v44 = vld [vmem:[%s2500_s2 + $0x70] sm:$0xff] }
   0xf   :  { %246 = vmatpush.msra.mxu3 %v1565_v14  ;;  %123 = vmatpush.msra.mxu2 %v1617_v22  ;;  %v1736_v41 = vld [vmem:[%s2500_s2] sm:$0xff]  ;;  %v1741_v42 = vld [vmem:[%s2500_s2 + $0x8] sm:$0xff]  ;;  %v1766_v45 = vld [vmem:[%s2500_s2 + $0x58] sm:$0xff] }
  0x10   :  { %86 = vmatpush.msra.mxu0 %v1584_v17  ;;  %106 = vmatpush.msra.mxu1 %v1589_v18  ;;  %v1750_v43 = vld [vmem:[%s2501_s1] sm:$0xff]  ;;  %v1782_v47 = vld [vmem:[%s2500_s2 + $0x28] sm:$0xff]  ;;  %v1791_v48 = vld [vmem:[%s2500_s2 + $0x10] sm:$0xff] }
  0x11   :  { %247 = vmatpush.msra.mxu3 %v1584_v17  ;;  %124 = vmatpush.msra.mxu2 %v1636_v25  ;;  %v1773_v46 = vld [vmem:[%s2500_s2 + $0x40] sm:$0xff]  ;;  %v29_v50 = vld [vmem:[%s2503_s0 + $0x8] sm:$0xff] }
  0x12   :  { %87 = vmatpush.msra.mxu0 %v1603_v20  ;;  %107 = vmatpush.msra.mxu1 %v1608_v21  ;;  %v28_v49 = vld [vmem:[%s2503_s0] sm:$0xff] }
  0x13   :  { %248 = vmatpush.msra.mxu3 %v1603_v20  ;;  %125 = vmatpush.msra.mxu2 %v1655_v28 }
  0x14   :  { %88 = vmatpush.msra.mxu0 %v1622_v23  ;;  %108 = vmatpush.msra.mxu1 %v1627_v24 }
  0x15   :  { %249 = vmatpush.msra.mxu3 %v1622_v23  ;;  %126 = vmatpush.msra.mxu2 %v1674_v31 }
  0x16   :  { %89 = vmatpush.msra.mxu0 %v1641_v26  ;;  %109 = vmatpush.msra.mxu1 %v1646_v27 }
  0x17   :  { %250 = vmatpush.msra.mxu3 %v1641_v26  ;;  %127 = vmatpush.msra.mxu2 %v1693_v34 }
  0x18   :  { %90 = vmatpush.msra.mxu0 %v1660_v29  ;;  %110 = vmatpush.msra.mxu1 %v1665_v30 }
  0x19   :  { %251 = vmatpush.msra.mxu3 %v1660_v29  ;;  %128 = vmatpush.msra.mxu2 %v1712_v37 }
  0x1a   :  { %91 = vmatpush.msra.mxu0 %v1679_v32  ;;  %111 = vmatpush.msra.mxu1 %v1684_v33 }
  0x1b   :  { %252 = vmatpush.msra.mxu3 %v1679_v32  ;;  %129 = vmatpush.msra.mxu2 %v1731_v40 }
  0x1c   :  { %92 = vmatpush.msra.mxu0 %v1698_v35  ;;  %112 = vmatpush.msra.mxu1 %v1703_v36 }
  0x1d   :  { %253 = vmatpush.msra.mxu3 %v1698_v35  ;;  %130 = vmatpush.msra.mxu2 %v1756_v44 }
  0x1e   :  { %93 = vmatpush.msra.mxu0 %v1717_v38  ;;  %113 = vmatpush.msra.mxu1 %v1722_v39 }
  0x1f   :  { %254 = vmatpush.msra.mxu3 %v1717_v38  ;;  %131 = vmatpush.msra.mxu2 %v1766_v45 }
  0x20   :  { %94 = vmatpush.msra.mxu0 %v1736_v41  ;;  %114 = vmatpush.msra.mxu1 %v1741_v42 }
  0x21   :  { %95 = vmatmul.f32.vlgmr.msra.gmra.mxu0 %v1750_v43  ;;  %115 = vmatmul.f32.vlgmr.msra.gmra.mxu1 %v1750_v43 }
  0x22   :  { %260 = vmatpush.msrb.mxu0 %v1486_v1  ;;  %280 = vmatpush.msrb.mxu1 %v1552_v12 }
  0x23   :  { %255 = vmatpush.msra.mxu3 %v1736_v41  ;;  %132 = vmatpush.msra.mxu2 %v1773_v46 }
  0x24   :  { %261 = vmatpush.msrb.mxu0 %v1498_v3  ;;  %281 = vmatpush.msrb.mxu1 %v1560_v13 }
  0x25   :  { %422 = vmatpush.msrb.mxu3 %v1486_v1  ;;  %133 = vmatpush.msra.mxu2 %v1782_v47 }
  0x26   :  { %262 = vmatpush.msrb.mxu0 %v1508_v5  ;;  %282 = vmatpush.msrb.mxu1 %v1579_v16 }
  0x27   :  { %423 = vmatpush.msrb.mxu3 %v1498_v3  ;;  %134 = vmatpush.msra.mxu2 %v1791_v48 }
  0x28   :  { %263 = vmatpush.msrb.mxu0 %v1521_v7  ;;  %283 = vmatpush.msrb.mxu1 %v1598_v19 }
  0x29   :  { %424 = vmatpush.msrb.mxu3 %v1508_v5  ;;  %135 = vmatmul.f32.vlgmr.msra.gmra.mxu2 %v1750_v43 }
  0x2a   :  { %264 = vmatpush.msrb.mxu0 %v1534_v9  ;;  %284 = vmatpush.msrb.mxu1 %v1617_v22 }
  0x2b   :  { %402 = vmatpush.msrb.mxu2 %v1481_v0  ;;  %425 = vmatpush.msrb.mxu3 %v1521_v7 }
  0x2c   :  { %265 = vmatpush.msrb.mxu0 %v1547_v11  ;;  %285 = vmatpush.msrb.mxu1 %v1636_v25 }
  0x2d   :  { %403 = vmatpush.msrb.mxu2 %v1491_v2  ;;  %426 = vmatpush.msrb.mxu3 %v1534_v9 }
  0x2e   :  { %266 = vmatpush.msrb.mxu0 %v1570_v15  ;;  %286 = vmatpush.msrb.mxu1 %v1655_v28 }
  0x2f   :  { %404 = vmatpush.msrb.mxu2 %v1503_v4  ;;  %427 = vmatpush.msrb.mxu3 %v1547_v11 }
  0x30   :  { %267 = vmatpush.msrb.mxu0 %v1589_v18  ;;  %287 = vmatpush.msrb.mxu1 %v1674_v31 }
  0x31   :  { %405 = vmatpush.msrb.mxu2 %v1516_v6  ;;  %428 = vmatpush.msrb.mxu3 %v1570_v15 }
  0x32   :  { %268 = vmatpush.msrb.mxu0 %v1608_v21  ;;  %288 = vmatpush.msrb.mxu1 %v1693_v34 }
  0x33   :  { %406 = vmatpush.msrb.mxu2 %v1529_v8  ;;  %429 = vmatpush.msrb.mxu3 %v1589_v18 }
  0x34   :  { %269 = vmatpush.msrb.mxu0 %v1627_v24  ;;  %289 = vmatpush.msrb.mxu1 %v1712_v37 }
  0x35   :  { %407 = vmatpush.msrb.mxu2 %v1542_v10  ;;  %430 = vmatpush.msrb.mxu3 %v1608_v21 }
  0x36   :  { %270 = vmatpush.msrb.mxu0 %v1646_v27  ;;  %290 = vmatpush.msrb.mxu1 %v1731_v40 }
  0x37   :  { %408 = vmatpush.msrb.mxu2 %v1565_v14  ;;  %431 = vmatpush.msrb.mxu3 %v1627_v24 }
  0x38   :  { %271 = vmatpush.msrb.mxu0 %v1665_v30  ;;  %291 = vmatpush.msrb.mxu1 %v1756_v44 }
  0x39   :  { %409 = vmatpush.msrb.mxu2 %v1584_v17  ;;  %432 = vmatpush.msrb.mxu3 %v1646_v27 }
  0x3a   :  { %272 = vmatpush.msrb.mxu0 %v1684_v33  ;;  %292 = vmatpush.msrb.mxu1 %v1766_v45 }
  0x3b   :  { %410 = vmatpush.msrb.mxu2 %v1603_v20  ;;  %433 = vmatpush.msrb.mxu3 %v1665_v30 }
  0x3c   :  { %273 = vmatpush.msrb.mxu0 %v1703_v36  ;;  %293 = vmatpush.msrb.mxu1 %v1773_v46 }
  0x3d   :  { %411 = vmatpush.msrb.mxu2 %v1622_v23  ;;  %434 = vmatpush.msrb.mxu3 %v1684_v33 }
  0x3e   :  { %274 = vmatpush.msrb.mxu0 %v1722_v39  ;;  %294 = vmatpush.msrb.mxu1 %v1782_v47 }
  0x3f   :  { %412 = vmatpush.msrb.mxu2 %v1641_v26  ;;  %435 = vmatpush.msrb.mxu3 %v1703_v36 }
  0x40   :  { %275 = vmatpush.msrb.mxu0 %v1741_v42  ;;  %295 = vmatpush.msrb.mxu1 %v1791_v48 }
  0x41   :  { %413 = vmatpush.msrb.mxu2 %v1660_v29  ;;  %436 = vmatpush.msrb.mxu3 %v1722_v39 }
  0x42   :  { %442 = vmatpush.msra.mxu0 %v1552_v12  ;;  %564 = vmatpush.msra.mxu1 %v1481_v0 }
  0x43   :  { %414 = vmatpush.msrb.mxu2 %v1679_v32  ;;  %437 = vmatpush.msrb.mxu3 %v1741_v42 }
  0x44   :  { %443 = vmatpush.msra.mxu0 %v1560_v13  ;;  %565 = vmatpush.msra.mxu1 %v1491_v2 }
  0x45   :  { %415 = vmatpush.msrb.mxu2 %v1698_v35 }
  0x46   :  { %444 = vmatpush.msra.mxu0 %v1579_v16  ;;  %566 = vmatpush.msra.mxu1 %v1503_v4 }
  0x47   :  { %416 = vmatpush.msrb.mxu2 %v1717_v38 }
  0x48   :  { %445 = vmatpush.msra.mxu0 %v1598_v19  ;;  %567 = vmatpush.msra.mxu1 %v1516_v6 }
  0x49   :  { %417 = vmatpush.msrb.mxu2 %v1736_v41 }
  0x4a   :  { %446 = vmatpush.msra.mxu0 %v1617_v22  ;;  %568 = vmatpush.msra.mxu1 %v1529_v8 }
  0x4b   :  { %584 = vmatpush.msra.mxu2 %v1486_v1  ;;  %v1911_v1 = vld [vmem:[%s2502_s3] ss:$0 sm:$0xff] }
  0x4c   :  { %447 = vmatpush.msra.mxu0 %v1636_v25  ;;  %569 = vmatpush.msra.mxu1 %v1542_v10 }
  0x4d   :  { %585 = vmatpush.msra.mxu2 %v1498_v3 }
  0x4e   :  { %448 = vmatpush.msra.mxu0 %v1655_v28  ;;  %570 = vmatpush.msra.mxu1 %v1565_v14 }
  0x4f   :  { %586 = vmatpush.msra.mxu2 %v1508_v5 }
  0x50   :  { %449 = vmatpush.msra.mxu0 %v1674_v31  ;;  %571 = vmatpush.msra.mxu1 %v1584_v17  ;;  %v30_v17 = vld [vmem:[%s2503_s0 + $0x10] sm:$0xff] }
  0x51   :  { %587 = vmatpush.msra.mxu2 %v1521_v7 }
  0x52   :  { %450 = vmatpush.msra.mxu0 %v1693_v34  ;;  %572 = vmatpush.msra.mxu1 %v1603_v20 }
  0x53   :  { %588 = vmatpush.msra.mxu2 %v1534_v9 }
  0x54   :  { %451 = vmatpush.msra.mxu0 %v1712_v37  ;;  %573 = vmatpush.msra.mxu1 %v1622_v23 }
  0x55   :  { %589 = vmatpush.msra.mxu2 %v1547_v11 }
  0x56   :  { %452 = vmatpush.msra.mxu0 %v1731_v40  ;;  %574 = vmatpush.msra.mxu1 %v1641_v26 }
  0x57   :  { %590 = vmatpush.msra.mxu2 %v1570_v15 }
  0x58   :  { %453 = vmatpush.msra.mxu0 %v1756_v44  ;;  %575 = vmatpush.msra.mxu1 %v1660_v29 }
  0x59   :  { %591 = vmatpush.msra.mxu2 %v1589_v18 }
  0x5a   :  { %454 = vmatpush.msra.mxu0 %v1766_v45  ;;  %576 = vmatpush.msra.mxu1 %v1679_v32 }
  0x5b   :  { %592 = vmatpush.msra.mxu2 %v1608_v21 }
  0x5c   :  { %455 = vmatpush.msra.mxu0 %v1773_v46  ;;  %577 = vmatpush.msra.mxu1 %v1698_v35 }
  0x5d   :  { %593 = vmatpush.msra.mxu2 %v1627_v24 }
  0x5e   :  { %456 = vmatpush.msra.mxu0 %v1782_v47  ;;  %578 = vmatpush.msra.mxu1 %v1717_v38 }
  0x5f   :  { %594 = vmatpush.msra.mxu2 %v1646_v27 }
  0x60   :  { %457 = vmatpush.msra.mxu0 %v1791_v48  ;;  %579 = vmatpush.msra.mxu1 %v1736_v41 }
  0x61   :  { %595 = vmatpush.msra.mxu2 %v1665_v30 }
  0x63   :  { %596 = vmatpush.msra.mxu2 %v1684_v33 }
  0x65   :  { %597 = vmatpush.msra.mxu2 %v1703_v36 }
  0x67   :  { %598 = vmatpush.msra.mxu2 %v1722_v39 }
  0x69   :  { %599 = vmatpush.msra.mxu2 %v1741_v42 }
  0x9e   :  { %v96_v51 = vpop.f32.mrf.mxu0  ;;  %v116_v52 = vpop.f32.mrf.mxu1 }
  0x9f   :  { %v139_v53 = vadd.f32 %v96_v51, %v28_v49  ;;  %v159_v54 = vadd.f32 %v116_v52, %v29_v50 }
  0xa1   :  { %v1327_v55 = vmul.f32 -1.442695, %v139_v53  ;;  %v1328_v56 = vmul.f32 -1.442695, %v159_v54 }
  0xa3   :  { %1372 = vpow2.f32 %v1327_v55 }
  0xa4   :  { %1374 = vpow2.f32 %v1328_v56 }
  0xa9   :  { %v1373_v57 = vpop.eup %1372 }
  0xaa   :  { %v1375_v58 = vpop.eup %1374  ;;  %v143_v59 = vadd.f32 1.0, %v1373_v57  ;;  %v1331_v57 = vld [vmem:[%s2503_s0 + $0x28] sm:$0xff] }
  0xab   :  { %v163_v60 = vadd.f32 1.0, %v1375_v58 }
  0xac   :  { %1376 = vrcp.f32 %v143_v59  ;;  %v136_v4 = vpop.f32.mrf.mxu2  ;;  %v155_v5 = vand.u32 2147483648, %v143_v59  ;;  %v153_v7 = vand.u32 2147483647, %v143_v59  ;;  %vm149_vm1 = vweird.f32 %v143_v59 }
  0xad   :  { %1378 = vrcp.f32 %v163_v60  ;;  %v179_v10 = vadd.f32 %v1911_v1, %v136_v4  ;;  %vm169_vm4 = vweird.f32 %v163_v60  ;;  %v175_v20 = vand.u32 2147483648, %v163_v60 }
  0xae   :  { %v156_v11 = vor.u32 1.1754944e-38, %v155_v5  ;;  %vm154_vm3 = vcmp.eq.f32.partialorder %v153_v7, 8.507059e+37  ;;  %v173_v23 = vand.u32 2147483647, %v163_v60  ;;  %v1335_v7 = vld [vmem:[%s2503_s0 + $0x30] sm:$0xff] }
  0xaf   :  { %v176_v27 = vor.u32 1.1754944e-38, %v175_v20 }
  0xb0   :  { %vm174_vm7 = vcmp.eq.f32.partialorder %v173_v23, 8.507059e+37 }
  0xb2   :  { %v1377_v61 = vpop.eup %1376 }
  0xb3   :  { %v1379_v62 = vpop.eup %1378  ;;  %v145_v63 = vmul.f32 %v1377_v61, %v143_v59  ;;  %vm150_vm0 = vweird.f32 %v1377_v61 }
  0xb4   :  { %v165_v0 = vmul.f32 %v1379_v62, %v163_v60  ;;  %vm151_vm2 = vmor %vm149_vm1, %vm150_vm0  ;;  %vm170_vm5 = vweird.f32 %v1379_v62 }
  0xb5   :  { %v146_v2 = vsub.f32 1.0, %v145_v63  ;;  %vm171_vm6 = vmor %vm169_vm4, %vm170_vm5 }
  0xb6   :  { %v166_v3 = vsub.f32 1.0, %v165_v0 }
  0xb7   :  { %v147_v6 = vmul.f32 %v1377_v61, %v146_v2 }
  0xb8   :  { %v167_v8 = vmul.f32 %v1379_v62, %v166_v3 }
  0xb9   :  { %v148_v9 = vadd.f32 %v1377_v61, %v147_v6 }
  0xba   :  { %v168_v15 = vadd.f32 %v1379_v62, %v167_v8  ;;  %v1336_v8 = vld [vmem:[%s2503_s0 + $0x38] sm:$0xff] }
  0xbb   :  { %v152_v14 = vsel %vm151_vm2, %v1377_v61, %v148_v9 }
  0xbc   :  { %v157_v18 = vsel %vm154_vm3, %v156_v11, %v152_v14  ;;  %v172_v26 = vsel %vm171_vm6, %v1379_v62, %v168_v15 }
  0xbd   :  { %v180_v21 = vmul.f32 %v179_v10, %v157_v18  ;;  %v177_v29 = vsel %vm174_vm7, %v176_v27, %v172_v26 }
  0xbe   :  { %v183_v30 = vsub.f32 1.0, %v177_v29  ;;  %v185_v35 = vmul.f32 %v177_v29, %v1750_v43 }
  0xbf   :  { %v181_v24 = vadd.f32 %v180_v21, %v30_v17 }
  0xc1   :  { %1380 = vtanh.f32 %v181_v24 }
  0xc7   :  { %v1381_v32 = vpop.eup %1380 }
  0xc8   :  { %v184_v33 = vmul.f32 %v1381_v32, %v183_v30 }
  0xca   :  { %v1918_v36 = vadd.f32 %v185_v35, %v184_v33 }
  0xcc   :  { %187 = vst [vmem:[%s2504_s4] sm:$0xff] %v1918_v36  ;;  %256 = vmatmul.f32.vlgmr.msra.gmra.mxu3 %v1918_v36  ;;  %276 = vmatmul.f32.vlgmr.msrb.gmra.mxu0 %v1918_v36 }
  0xcd   :  { %296 = vmatmul.f32.vlgmr.msrb.gmra.mxu1 %v1918_v36  ;;  %604 = vmatpush.msra.mxu3 %v1552_v12  ;;  %v1330_v12 = vld [vmem:[%s2503_s0 + $0x20] sm:$0xff] }
  0xcf   :  { %605 = vmatpush.msra.mxu3 %v1560_v13 }
  0xd1   :  { %606 = vmatpush.msra.mxu3 %v1579_v16 }
  0xd3   :  { %607 = vmatpush.msra.mxu3 %v1598_v19 }
  0xd5   :  { %608 = vmatpush.msra.mxu3 %v1617_v22  ;;  %v1329_v22 = vld [vmem:[%s2503_s0 + $0x18] sm:$0xff] }
  0xd7   :  { %609 = vmatpush.msra.mxu3 %v1636_v25 }
  0xd9   :  { %610 = vmatpush.msra.mxu3 %v1655_v28 }
  0xdb   :  { %611 = vmatpush.msra.mxu3 %v1674_v31 }
  0xdd   :  { %612 = vmatpush.msra.mxu3 %v1693_v34 }
  0xdf   :  { %613 = vmatpush.msra.mxu3 %v1712_v37 }
  0xe1   :  { %614 = vmatpush.msra.mxu3 %v1731_v40 }
  0xe3   :  { %615 = vmatpush.msra.mxu3 %v1756_v44 }
  0xe5   :  { %616 = vmatpush.msra.mxu3 %v1766_v45 }
  0xe7   :  { %617 = vmatpush.msra.mxu3 %v1773_v46 }
  0xe9   :  { %618 = vmatpush.msra.mxu3 %v1782_v47 }
  0xeb   :  { %619 = vmatpush.msra.mxu3 %v1791_v48 }
 0x149   :  { %v277_v13 = vpop.f32.mrf.mxu0 }
 0x14a   :  { %v320_v16 = vadd.f32 %v1330_v12, %v277_v13  ;;  %v297_v50 = vpop.f32.mrf.mxu1 }
 0x14b   :  { %v340_v53 = vadd.f32 %v1911_v1, %v297_v50  ;;  %v1984_v50 = vld [vmem:[%s2500_s2 + $0x170] sm:$0xff] }
 0x14c   :  { %v1333_v19 = vmul.f32 -1.442695, %v320_v16  ;;  %746 = vmatpush.msrb.mxu1 %v1984_v50 }
 0x14e   :  { %1382 = vpow2.f32 %v1333_v19 }
 0x14f   :  { %v257_v25 = vpop.f32.mrf.mxu3 }
 0x150   :  { %v300_v28 = vadd.f32 %v1329_v22, %v257_v25 }
 0x152   :  { %v1332_v31 = vmul.f32 -1.442695, %v300_v28 }
 0x154   :  { %v1383_v34 = vpop.eup %1382  ;;  %1384 = vpow2.f32 %v1332_v31 }
 0x155   :  { %v324_v37 = vadd.f32 1.0, %v1383_v34  ;;  %v1337_v34 = vld [vmem:[%s2503_s0 + $0x40] sm:$0xff] }
 0x157   :  { %1386 = vrcp.f32 %v324_v37  ;;  %v336_v58 = vand.u32 2147483648, %v324_v37  ;;  %vm330_vm13 = vweird.f32 %v324_v37  ;;  %v334_v60 = vand.u32 2147483647, %v324_v37 }
 0x159   :  { %v337_v63 = vor.u32 1.1754944e-38, %v336_v58  ;;  %vm335_vm15 = vcmp.eq.f32.partialorder %v334_v60, 8.507059e+37  ;;  %v2035_v58 = vld [vmem:[%s2500_s2 + $0x120] sm:$0xff]  ;;  %v2045_v60 = vld [vmem:[%s2500_s2 + $0x130] sm:$0xff] }
 0x15a   :  { %v1385_v38 = vpop.eup %1384 }
 0x15b   :  { %v304_v39 = vadd.f32 1.0, %v1385_v38 }
 0x15d   :  { %1388 = vrcp.f32 %v304_v39  ;;  %v1387_v40 = vpop.eup %1386  ;;  %v316_v46 = vand.u32 2147483648, %v304_v39  ;;  %v314_v48 = vand.u32 2147483647, %v304_v39  ;;  %vm310_vm9 = vweird.f32 %v304_v39 }
 0x15e   :  { %v326_v41 = vmul.f32 %v1387_v40, %v324_v37  ;;  %vm331_vm12 = vweird.f32 %v1387_v40 }
 0x15f   :  { %v317_v52 = vor.u32 1.1754944e-38, %v316_v46  ;;  %vm315_vm11 = vcmp.eq.f32.partialorder %v314_v48, 8.507059e+37  ;;  %vm332_vm14 = vmor %vm330_vm13, %vm331_vm12 }
 0x160   :  { %v327_v44 = vsub.f32 1.0, %v326_v41 }
 0x162   :  { %v328_v49 = vmul.f32 %v1387_v40, %v327_v44 }
 0x163   :  { %v1389_v42 = vpop.eup %1388 }
 0x164   :  { %v306_v43 = vmul.f32 %v1389_v42, %v304_v39  ;;  %vm311_vm8 = vweird.f32 %v1389_v42  ;;  %v329_v55 = vadd.f32 %v1387_v40, %v328_v49  ;;  %v1979_v49 = vld [vmem:[%s2500_s2 + $0x168] sm:$0xff] }
 0x165   :  { %vm312_vm10 = vmor %vm310_vm9, %vm311_vm8  ;;  %726 = vmatpush.msrb.mxu0 %v1979_v49 }
 0x166   :  { %v307_v45 = vsub.f32 1.0, %v306_v43  ;;  %v333_v62 = vsel %vm332_vm14, %v1387_v40, %v329_v55  ;;  %v2016_v55 = vld [vmem:[%s2500_s2 + $0x138] sm:$0xff] }
 0x167   :  { %v338_v0 = vsel %vm335_vm15, %v337_v63, %v333_v62  ;;  %v2059_v62 = vld [vmem:[%s2500_s2 + $0x110] sm:$0xff]  ;;  %v2064_v63 = vld [vmem:[%s2500_s2 + $0x118] sm:$0xff] }
 0x168   :  { %v308_v47 = vmul.f32 %v1389_v42, %v307_v45  ;;  %v344_v2 = vsub.f32 1.0, %v338_v0  ;;  %v346_v5 = vmul.f32 %v338_v0, %v1918_v36  ;;  %v2073_v0 = vld [vmem:[%s2500_s2 + $0xf0] sm:$0xff] }
 0x16a   :  { %v309_v51 = vadd.f32 %v1389_v42, %v308_v47 }
 0x16c   :  { %v313_v54 = vsel %vm312_vm10, %v1389_v42, %v309_v51  ;;  %v1989_v51 = vld [vmem:[%s2500_s2 + $0x178] sm:$0xff] }
 0x16d   :  { %v318_v56 = vsel %vm315_vm11, %v317_v52, %v313_v54  ;;  %v1997_v52 = vld [vmem:[%s2500_s2 + $0x150] sm:$0xff]  ;;  %v2007_v54 = vld [vmem:[%s2500_s2 + $0x160] sm:$0xff] }
 0x16e   :  { %v341_v59 = vmul.f32 %v340_v53, %v318_v56  ;;  %v2002_v53 = vld [vmem:[%s2500_s2 + $0x158] sm:$0xff]  ;;  %727 = vmatpush.msrb.mxu0 %v1997_v52  ;;  %v2021_v56 = vld [vmem:[%s2500_s2 + $0x140] sm:$0xff] }
 0x16f   :  { %747 = vmatpush.msrb.mxu1 %v2002_v53 }
 0x170   :  { %v342_v61 = vadd.f32 %v1331_v57, %v341_v59  ;;  %v2026_v57 = vld [vmem:[%s2500_s2 + $0x148] sm:$0xff]  ;;  %728 = vmatpush.msrb.mxu0 %v2016_v55 }
 0x171   :  { %748 = vmatpush.msrb.mxu1 %v2021_v56  ;;  %v2040_v59 = vld [vmem:[%s2500_s2 + $0x128] sm:$0xff] }
 0x172   :  { %1390 = vtanh.f32 %v342_v61  ;;  %729 = vmatpush.msrb.mxu0 %v2035_v58  ;;  %v2054_v61 = vld [vmem:[%s2500_s2 + $0x108] sm:$0xff] }
 0x173   :  { %749 = vmatpush.msrb.mxu1 %v2040_v59 }
 0x174   :  { %730 = vmatpush.msrb.mxu0 %v2054_v61 }
 0x175   :  { %750 = vmatpush.msrb.mxu1 %v2059_v62 }
 0x176   :  { %731 = vmatpush.msrb.mxu0 %v2073_v0 }
 0x178   :  { %v1391_v3 = vpop.eup %1390 }
 0x179   :  { %v345_v4 = vmul.f32 %v1391_v3, %v344_v2  ;;  %v2078_v2 = vld [vmem:[%s2500_s2 + $0xf8] sm:$0xff]  ;;  %v2083_v3 = vld [vmem:[%s2500_s2 + $0x100] sm:$0xff] }
 0x17a   :  { %751 = vmatpush.msrb.mxu1 %v2078_v2 }
 0x17b   :  { %v347_v6 = vadd.f32 %v346_v5, %v345_v4  ;;  %v2092_v4 = vld [vmem:[%s2500_s2 + $0xd8] sm:$0xff]  ;;  %v2097_v5 = vld [vmem:[%s2500_s2 + $0xe0] sm:$0xff] }
 0x17c   :  { %732 = vmatpush.msrb.mxu0 %v2092_v4  ;;  %752 = vmatpush.msrb.mxu1 %v2097_v5 }
 0x17d   :  { %1334 = vst [vmem:[%s2504_s4 + $0x8] sm:$0xff] %v347_v6  ;;  %418 = vmatmul.f32.vlgmr.msrb.gmra.mxu2 %v347_v6  ;;  %438 = vmatmul.f32.vlgmr.msrb.gmra.mxu3 %v347_v6 }
 0x17e   :  { %458 = vmatmul.f32.vlgmr.msra.gmra.mxu0 %v347_v6  ;;  %766 = vmatpush.msrb.mxu2 %v1989_v51 }
 0x17f   :  { %888 = vmatpush.msrb.mxu3 %v1979_v49 }
 0x180   :  { %767 = vmatpush.msrb.mxu2 %v2007_v54 }
 0x181   :  { %889 = vmatpush.msrb.mxu3 %v1997_v52 }
 0x182   :  { %768 = vmatpush.msrb.mxu2 %v2026_v57 }
 0x183   :  { %890 = vmatpush.msrb.mxu3 %v2016_v55 }
 0x184   :  { %769 = vmatpush.msrb.mxu2 %v2045_v60 }
 0x185   :  { %891 = vmatpush.msrb.mxu3 %v2035_v58 }
 0x186   :  { %770 = vmatpush.msrb.mxu2 %v2064_v63 }
 0x187   :  { %892 = vmatpush.msrb.mxu3 %v2054_v61 }
 0x188   :  { %771 = vmatpush.msrb.mxu2 %v2083_v3 }
 0x189   :  { %893 = vmatpush.msrb.mxu3 %v2073_v0 }
 0x18b   :  { %894 = vmatpush.msrb.mxu3 %v2092_v4 }
 0x1fb   :  { %v459_v12 = vpop.f32.mrf.mxu0 }
 0x1fc   :  { %v502_v22 = vadd.f32 %v1911_v1, %v459_v12 }
 0x200   :  { %v419_v9 = vpop.f32.mrf.mxu2  ;;  %v439_v10 = vpop.f32.mrf.mxu3 }
 0x201   :  { %v462_v11 = vadd.f32 %v1335_v7, %v419_v9  ;;  %v482_v14 = vadd.f32 %v1336_v8, %v439_v10  ;;  %v2111_v7 = vld [vmem:[%s2500_s2 + $0xc0] sm:$0xff]  ;;  %v2116_v8 = vld [vmem:[%s2500_s2 + $0xc8] sm:$0xff]  ;;  %v2121_v9 = vld [vmem:[%s2500_s2 + $0xd0] sm:$0xff] }
 0x202   :  { %v1341_v10 = vld [vmem:[%s2503_s0 + $0x48] sm:$0xff]  ;;  %733 = vmatpush.msrb.mxu0 %v2111_v7  ;;  %753 = vmatpush.msrb.mxu1 %v2116_v8 }
 0x203   :  { %v1338_v15 = vmul.f32 -1.442695, %v462_v11  ;;  %v1339_v17 = vmul.f32 -1.442695, %v482_v14  ;;  %v2133_v11 = vld [vmem:[%s2500_s2 + $0xa8] sm:$0xff]  ;;  %v2138_v14 = vld [vmem:[%s2500_s2 + $0xb0] sm:$0xff]  ;;  %895 = vmatpush.msrb.mxu3 %v2111_v7 }
 0x204   :  { %734 = vmatpush.msrb.mxu0 %v2133_v11  ;;  %754 = vmatpush.msrb.mxu1 %v2138_v14 }
 0x205   :  { %1392 = vpow2.f32 %v1338_v15  ;;  %v2143_v15 = vld [vmem:[%s2500_s2 + $0xb8] sm:$0xff]  ;;  %896 = vmatpush.msrb.mxu3 %v2133_v11 }
 0x206   :  { %1394 = vpow2.f32 %v1339_v17 }
 0x20b   :  { %v1393_v18 = vpop.eup %1392 }
 0x20c   :  { %v1395_v20 = vpop.eup %1394  ;;  %v466_v21 = vadd.f32 1.0, %v1393_v18 }
 0x20d   :  { %v486_v23 = vadd.f32 1.0, %v1395_v20  ;;  %v2152_v20 = vld [vmem:[%s2500_s2 + $0x90] sm:$0xff] }
 0x20e   :  { %1396 = vrcp.f32 %v466_v21  ;;  %v478_v32 = vand.u32 2147483648, %v466_v21  ;;  %v476_v36 = vand.u32 2147483647, %v466_v21  ;;  %vm472_vm1 = vweird.f32 %v466_v21  ;;  %735 = vmatpush.msrb.mxu0 %v2152_v20  ;;  %897 = vmatpush.msrb.mxu3 %v2152_v20 }
 0x20f   :  { %1398 = vrcp.f32 %v486_v23  ;;  %v498_v38 = vand.u32 2147483648, %v486_v23  ;;  %vm492_vm5 = vweird.f32 %v486_v23  ;;  %v496_v39 = vand.u32 2147483647, %v486_v23 }
 0x210   :  { %v479_v19 = vor.u32 1.1754944e-38, %v478_v32  ;;  %vm477_vm3 = vcmp.eq.f32.partialorder %v476_v36, 8.507059e+37  ;;  %v2193_v32 = vld [vmem:[%s2500_s2 + $0x60] sm:$0xff] }
 0x211   :  { %v499_v42 = vor.u32 1.1754944e-38, %v498_v38  ;;  %vm497_vm7 = vcmp.eq.f32.partialorder %v496_v39, 8.507059e+37  ;;  %v2259_v38 = vld [vmem:[%s2500_s2 + $0x28] sm:$0xff] }
 0x214   :  { %v1397_v24 = vpop.eup %1396 }
 0x215   :  { %v1399_v26 = vpop.eup %1398  ;;  %v468_v27 = vmul.f32 %v1397_v24, %v466_v21  ;;  %vm473_vm0 = vweird.f32 %v1397_v24  ;;  %v2157_v21 = vld [vmem:[%s2500_s2 + $0x98] sm:$0xff] }
 0x216   :  { %v488_v29 = vmul.f32 %v1399_v26, %v486_v23  ;;  %vm474_vm2 = vmor %vm472_vm1, %vm473_vm0  ;;  %vm493_vm4 = vweird.f32 %v1399_v26  ;;  %755 = vmatpush.msrb.mxu1 %v2157_v21  ;;  %v2165_v23 = vld [vmem:[%s2500_s2 + $0xa0] sm:$0xff] }
 0x217   :  { %v469_v30 = vsub.f32 1.0, %v468_v27  ;;  %vm494_vm6 = vmor %vm492_vm5, %vm493_vm4  ;;  %v2176_v27 = vld [vmem:[%s2500_s2 + $0x80] sm:$0xff] }
 0x218   :  { %v489_v33 = vsub.f32 1.0, %v488_v29  ;;  %v2181_v29 = vld [vmem:[%s2500_s2 + $0x88] sm:$0xff]  ;;  %756 = vmatpush.msrb.mxu1 %v2176_v27 }
 0x219   :  { %v470_v35 = vmul.f32 %v1397_v24, %v469_v30  ;;  %v1342_v30 = vld [vmem:[%s2503_s0 + $0x50] sm:$0xff] }
 0x21a   :  { %v490_v13 = vmul.f32 %v1399_v26, %v489_v33  ;;  %v2198_v33 = vld [vmem:[%s2500_s2 + $0x68] sm:$0xff] }
 0x21b   :  { %v471_v16 = vadd.f32 %v1397_v24, %v470_v35  ;;  %v2203_v35 = vld [vmem:[%s2500_s2 + $0x70] sm:$0xff]  ;;  %757 = vmatpush.msrb.mxu1 %v2198_v33 }
 0x21c   :  { %v491_v31 = vadd.f32 %v1399_v26, %v490_v13  ;;  %v2212_v13 = vld [vmem:[%s2500_s2 + $0x48] sm:$0xff] }
 0x21d   :  { %v475_v25 = vsel %vm474_vm2, %v1397_v24, %v471_v16  ;;  %v2217_v16 = vld [vmem:[%s2500_s2 + $0x50] sm:$0xff] }
 0x21e   :  { %v480_v28 = vsel %vm477_vm3, %v479_v19, %v475_v25  ;;  %v495_v41 = vsel %vm494_vm6, %v1399_v26, %v491_v31  ;;  %v2171_v26 = vld [vmem:[%s2500_s2 + $0x78] sm:$0xff]  ;;  %758 = vmatpush.msrb.mxu1 %v2217_v16  ;;  %v2231_v25 = vld [vmem:[%s2500_s2 + $0x30] sm:$0xff]  ;;  %v2241_v31 = vld [vmem:[%s2500_s2 + $0x40] sm:$0xff] }
 0x21f   :  { %v503_v37 = vmul.f32 %v502_v22, %v480_v28  ;;  %v500_v43 = vsel %vm497_vm7, %v499_v42, %v495_v41  ;;  %736 = vmatpush.msrb.mxu0 %v2171_v26  ;;  %898 = vmatpush.msrb.mxu3 %v2171_v26  ;;  %v2222_v19 = vld [vmem:[%s2500_s2 + $0x58] sm:$0xff]  ;;  %v2270_v41 = vld [vmem:[%s2500_s2 + $0x8] sm:$0xff] }
 0x220   :  { %v506_v44 = vsub.f32 1.0, %v500_v43  ;;  %v508_v47 = vmul.f32 %v500_v43, %v347_v6  ;;  %v2102_v6 = vld [vmem:[%s2500_s2 + $0xe8] sm:$0xff]  ;;  %v2236_v28 = vld [vmem:[%s2500_s2 + $0x38] sm:$0xff]  ;;  %v2278_v43 = vld [vmem:[%s2500_s2 + $0x10] sm:$0xff] }
 0x221   :  { %v504_v40 = vadd.f32 %v1337_v34, %v503_v37  ;;  %772 = vmatpush.msrb.mxu2 %v2102_v6  ;;  %737 = vmatpush.msrb.mxu0 %v2193_v32  ;;  %v2249_v34 = vld [vmem:[%s2500_s2 + $0x18] sm:$0xff]  ;;  %v2254_v37 = vld [vmem:[%s2500_s2 + $0x20] sm:$0xff] }
 0x222   :  { %899 = vmatpush.msrb.mxu3 %v2193_v32  ;;  %759 = vmatpush.msrb.mxu1 %v2236_v28 }
 0x223   :  { %1400 = vtanh.f32 %v504_v40  ;;  %773 = vmatpush.msrb.mxu2 %v2121_v9  ;;  %738 = vmatpush.msrb.mxu0 %v2212_v13  ;;  %v2265_v40 = vld [vmem:[%s2500_s2] sm:$0xff] }
 0x224   :  { %900 = vmatpush.msrb.mxu3 %v2212_v13  ;;  %760 = vmatpush.msrb.mxu1 %v2254_v37 }
 0x225   :  { %774 = vmatpush.msrb.mxu2 %v2143_v15  ;;  %739 = vmatpush.msrb.mxu0 %v2231_v25 }
 0x226   :  { %901 = vmatpush.msrb.mxu3 %v2231_v25  ;;  %761 = vmatpush.msrb.mxu1 %v2270_v41 }
 0x227   :  { %775 = vmatpush.msrb.mxu2 %v2165_v23  ;;  %740 = vmatpush.msrb.mxu0 %v2249_v34 }
 0x228   :  { %902 = vmatpush.msrb.mxu3 %v2249_v34 }
 0x229   :  { %v1401_v45 = vpop.eup %1400  ;;  %776 = vmatpush.msrb.mxu2 %v2181_v29  ;;  %741 = vmatpush.msrb.mxu0 %v2265_v40 }
 0x22a   :  { %v507_v46 = vmul.f32 %v1401_v45, %v506_v44  ;;  %903 = vmatpush.msrb.mxu3 %v2265_v40 }
 0x22b   :  { %777 = vmatpush.msrb.mxu2 %v2203_v35  ;;  %908 = vmatpush.msra.mxu0 %v1984_v50 }
 0x22c   :  { %v1967_v48 = vadd.f32 %v508_v47, %v507_v46 }
 0x22d   :  { %778 = vmatpush.msrb.mxu2 %v2222_v19  ;;  %909 = vmatpush.msra.mxu0 %v2002_v53 }
 0x22e   :  { %1340 = vst [vmem:[%s2504_s4 + $0x10] sm:$0xff] %v1967_v48  ;;  %580 = vmatmul.f32.vlgmr.msra.gmra.mxu1 %v1967_v48  ;;  %600 = vmatmul.f32.vlgmr.msra.gmra.mxu2 %v1967_v48 }
 0x22f   :  { %620 = vmatmul.f32.vlgmr.msra.gmra.mxu3 %v1967_v48  ;;  %779 = vmatpush.msrb.mxu2 %v2241_v31 }
 0x230   :  { %928 = vmatpush.msra.mxu1 %v1989_v51  ;;  %1070 = vmatpush.msra.mxu3 %v1984_v50 }
 0x231   :  { %780 = vmatpush.msrb.mxu2 %v2259_v38  ;;  %910 = vmatpush.msra.mxu0 %v2021_v56 }
 0x232   :  { %929 = vmatpush.msra.mxu1 %v2007_v54  ;;  %1071 = vmatpush.msra.mxu3 %v2002_v53 }
 0x233   :  { %781 = vmatpush.msrb.mxu2 %v2278_v43  ;;  %911 = vmatpush.msra.mxu0 %v2040_v59 }
 0x234   :  { %930 = vmatpush.msra.mxu1 %v2026_v57  ;;  %1072 = vmatpush.msra.mxu3 %v2021_v56 }
 0x235   :  { %1050 = vmatpush.msra.mxu2 %v1979_v49  ;;  %912 = vmatpush.msra.mxu0 %v2059_v62 }
 0x236   :  { %931 = vmatpush.msra.mxu1 %v2045_v60  ;;  %1073 = vmatpush.msra.mxu3 %v2040_v59 }
 0x237   :  { %1051 = vmatpush.msra.mxu2 %v1997_v52  ;;  %913 = vmatpush.msra.mxu0 %v2078_v2 }
 0x238   :  { %932 = vmatpush.msra.mxu1 %v2064_v63  ;;  %1074 = vmatpush.msra.mxu3 %v2059_v62 }
 0x239   :  { %1052 = vmatpush.msra.mxu2 %v2016_v55  ;;  %914 = vmatpush.msra.mxu0 %v2097_v5 }
 0x23a   :  { %933 = vmatpush.msra.mxu1 %v2083_v3  ;;  %1075 = vmatpush.msra.mxu3 %v2078_v2 }
 0x23b   :  { %1053 = vmatpush.msra.mxu2 %v2035_v58  ;;  %915 = vmatpush.msra.mxu0 %v2116_v8 }
 0x23c   :  { %934 = vmatpush.msra.mxu1 %v2102_v6  ;;  %1076 = vmatpush.msra.mxu3 %v2097_v5 }
 0x23d   :  { %1054 = vmatpush.msra.mxu2 %v2054_v61  ;;  %916 = vmatpush.msra.mxu0 %v2138_v14 }
 0x23e   :  { %935 = vmatpush.msra.mxu1 %v2121_v9  ;;  %1077 = vmatpush.msra.mxu3 %v2116_v8 }
 0x23f   :  { %1055 = vmatpush.msra.mxu2 %v2073_v0  ;;  %917 = vmatpush.msra.mxu0 %v2157_v21 }
 0x240   :  { %936 = vmatpush.msra.mxu1 %v2143_v15  ;;  %1078 = vmatpush.msra.mxu3 %v2138_v14 }
 0x241   :  { %1056 = vmatpush.msra.mxu2 %v2092_v4  ;;  %918 = vmatpush.msra.mxu0 %v2176_v27 }
 0x242   :  { %937 = vmatpush.msra.mxu1 %v2165_v23  ;;  %1079 = vmatpush.msra.mxu3 %v2157_v21 }
 0x243   :  { %1057 = vmatpush.msra.mxu2 %v2111_v7  ;;  %919 = vmatpush.msra.mxu0 %v2198_v33 }
 0x244   :  { %938 = vmatpush.msra.mxu1 %v2181_v29  ;;  %1080 = vmatpush.msra.mxu3 %v2176_v27 }
 0x245   :  { %1058 = vmatpush.msra.mxu2 %v2133_v11  ;;  %920 = vmatpush.msra.mxu0 %v2217_v16 }
 0x246   :  { %939 = vmatpush.msra.mxu1 %v2203_v35  ;;  %1081 = vmatpush.msra.mxu3 %v2198_v33 }
 0x247   :  { %1059 = vmatpush.msra.mxu2 %v2152_v20  ;;  %921 = vmatpush.msra.mxu0 %v2236_v28 }
 0x248   :  { %940 = vmatpush.msra.mxu1 %v2222_v19  ;;  %1082 = vmatpush.msra.mxu3 %v2217_v16 }
 0x249   :  { %1060 = vmatpush.msra.mxu2 %v2171_v26  ;;  %922 = vmatpush.msra.mxu0 %v2254_v37 }
 0x24a   :  { %941 = vmatpush.msra.mxu1 %v2241_v31  ;;  %1083 = vmatpush.msra.mxu3 %v2236_v28 }
 0x24b   :  { %1061 = vmatpush.msra.mxu2 %v2193_v32  ;;  %923 = vmatpush.msra.mxu0 %v2270_v41 }
 0x24c   :  { %942 = vmatpush.msra.mxu1 %v2259_v38  ;;  %1084 = vmatpush.msra.mxu3 %v2254_v37 }
 0x24d   :  { %1062 = vmatpush.msra.mxu2 %v2212_v13 }
 0x24e   :  { %943 = vmatpush.msra.mxu1 %v2278_v43  ;;  %1085 = vmatpush.msra.mxu3 %v2270_v41 }
 0x24f   :  { %1063 = vmatpush.msra.mxu2 %v2231_v25 }
 0x251   :  { %1064 = vmatpush.msra.mxu2 %v2249_v34 }
 0x253   :  { %1065 = vmatpush.msra.mxu2 %v2265_v40 }
 0x2ab   :  { %v581_v17 = vpop.f32.mrf.mxu1 }
 0x2ac   :  { %v624_v18 = vadd.f32 %v1341_v10, %v581_v17 }
 0x2ae   :  { %v1344_v24 = vmul.f32 -1.442695, %v624_v18 }
 0x2b0   :  { %1402 = vpow2.f32 %v1344_v24 }
 0x2b1   :  { %v601_v36 = vpop.f32.mrf.mxu2 }
 0x2b2   :  { %v644_v12 = vadd.f32 %v1342_v30, %v601_v36  ;;  %v621_v36 = vpop.f32.mrf.mxu3 }
 0x2b4   :  { %v1345_v22 = vmul.f32 -1.442695, %v644_v12 }
 0x2b6   :  { %v1403_v39 = vpop.eup %1402  ;;  %1404 = vpow2.f32 %v1345_v22 }
 0x2b7   :  { %v628_v42 = vadd.f32 1.0, %v1403_v39 }
 0x2b9   :  { %1406 = vrcp.f32 %v628_v42  ;;  %v640_v17 = vand.u32 2147483648, %v628_v42  ;;  %v638_v24 = vand.u32 2147483647, %v628_v42  ;;  %vm634_vm9 = vweird.f32 %v628_v42 }
 0x2bb   :  { %v641_v39 = vor.u32 1.1754944e-38, %v640_v17  ;;  %vm639_vm11 = vcmp.eq.f32.partialorder %v638_v24, 8.507059e+37 }
 0x2bc   :  { %v1405_v44 = vpop.eup %1404 }
 0x2bd   :  { %v2290_v45 = vadd.f32 1.0, %v1405_v44 }
 0x2bf   :  { %v1407_v46 = vpop.eup %1406  ;;  %1408 = vrcp.f32 %v2290_v45  ;;  %vm654_vm13 = vweird.f32 %v2290_v45 }
 0x2c0   :  { %v630_v47 = vmul.f32 %v1407_v46, %v628_v42  ;;  %vm635_vm8 = vweird.f32 %v1407_v46  ;;  %v1343_v42 = vld [vmem:[%s2503_s0 + $0x58] sm:$0xff] }
 0x2c1   :  { %vm636_vm10 = vmor %vm634_vm9, %vm635_vm8 }
 0x2c2   :  { %v631_v10 = vsub.f32 1.0, %v630_v47 }
 0x2c4   :  { %v632_v18 = vmul.f32 %v1407_v46, %v631_v10  ;;  %v664_v10 = vadd.f32 %v1911_v1, %v621_v36  ;;  %v658_v36 = vand.u32 2147483647, %v2290_v45 }
 0x2c5   :  { %v1409_v30 = vpop.eup %1408 }
 0x2c6   :  { %v650_v12 = vmul.f32 %v1409_v30, %v2290_v45  ;;  %v633_v22 = vadd.f32 %v1407_v46, %v632_v18  ;;  %vm655_vm12 = vweird.f32 %v1409_v30  ;;  %vm659_vm15 = vcmp.eq.f32.partialorder %v658_v36, 8.507059e+37 }
 0x2c7   :  { %vm656_vm14 = vmor %vm654_vm13, %vm655_vm12 }
 0x2c8   :  { %v651_v44 = vsub.f32 1.0, %v650_v12  ;;  %v637_v47 = vsel %vm636_vm10, %v1407_v46, %v633_v22  ;;  %v660_v46 = vand.u32 2147483648, %v2290_v45 }
 0x2c9   :  { %v642_v18 = vsel %vm639_vm11, %v641_v39, %v637_v47 }
 0x2ca   :  { %v652_v17 = vmul.f32 %v1409_v30, %v651_v44  ;;  %v665_v24 = vmul.f32 %v664_v10, %v642_v18  ;;  %v661_v39 = vor.u32 1.1754944e-38, %v660_v46 }
 0x2cc   :  { %v653_v12 = vadd.f32 %v1409_v30, %v652_v17  ;;  %v666_v22 = vadd.f32 %v1343_v42, %v665_v24 }
 0x2ce   :  { %v657_v44 = vsel %vm656_vm14, %v1409_v30, %v653_v12  ;;  %1410 = vtanh.f32 %v666_v22 }
 0x2cf   :  { %v662_v45 = vsel %vm659_vm15, %v661_v39, %v657_v44 }
 0x2d0   :  { %v668_v30 = vsub.f32 1.0, %v662_v45  ;;  %v670_v42 = vmul.f32 %v662_v45, %v1967_v48  ;;  %v1347_v48 = vld [vmem:[%s2503_s0 + $0x60] sm:$0xff] }
 0x2d4   :  { %v1411_v47 = vpop.eup %1410 }
 0x2d5   :  { %v669_v10 = vmul.f32 %v1411_v47, %v668_v30 }
 0x2d7   :  { %v2354_v18 = vadd.f32 %v670_v42, %v669_v10 }
 0x2d9   :  { %1346 = vst [vmem:[%s2504_s4 + $0x18] sm:$0xff] %v2354_v18  ;;  %742 = vmatmul.f32.vlgmr.msrb.gmra.mxu0 %v2354_v18  ;;  %762 = vmatmul.f32.vlgmr.msrb.gmra.mxu1 %v2354_v18 }
 0x2da   :  { %782 = vmatmul.f32.vlgmr.msrb.gmra.mxu2 %v2354_v18  ;;  %1090 = vmatpush.msrb.mxu0 %v1989_v51 }
 0x2db   :  { %1212 = vmatpush.msrb.mxu1 %v1979_v49  ;;  %1232 = vmatpush.msrb.mxu2 %v1984_v50  ;;  %v1348_v49 = vld [vmem:[%s2503_s0 + $0x68] sm:$0xff] }
 0x2dc   :  { %1091 = vmatpush.msrb.mxu0 %v2007_v54 }
 0x2dd   :  { %1213 = vmatpush.msrb.mxu1 %v1997_v52  ;;  %1233 = vmatpush.msrb.mxu2 %v2002_v53 }
 0x2de   :  { %1092 = vmatpush.msrb.mxu0 %v2026_v57 }
 0x2df   :  { %1214 = vmatpush.msrb.mxu1 %v2016_v55  ;;  %1234 = vmatpush.msrb.mxu2 %v2021_v56 }
 0x2e0   :  { %1093 = vmatpush.msrb.mxu0 %v2045_v60 }
 0x2e1   :  { %1215 = vmatpush.msrb.mxu1 %v2035_v58  ;;  %1235 = vmatpush.msrb.mxu2 %v2040_v59 }
 0x2e2   :  { %1094 = vmatpush.msrb.mxu0 %v2064_v63 }
 0x2e3   :  { %1216 = vmatpush.msrb.mxu1 %v2054_v61  ;;  %1236 = vmatpush.msrb.mxu2 %v2059_v62 }
 0x2e4   :  { %1095 = vmatpush.msrb.mxu0 %v2083_v3 }
 0x2e5   :  { %1217 = vmatpush.msrb.mxu1 %v2073_v0  ;;  %1237 = vmatpush.msrb.mxu2 %v2078_v2 }
 0x2e6   :  { %1096 = vmatpush.msrb.mxu0 %v2102_v6 }
 0x2e7   :  { %1218 = vmatpush.msrb.mxu1 %v2092_v4  ;;  %1238 = vmatpush.msrb.mxu2 %v2097_v5 }
 0x2e8   :  { %1097 = vmatpush.msrb.mxu0 %v2121_v9 }
 0x2e9   :  { %1219 = vmatpush.msrb.mxu1 %v2111_v7  ;;  %1239 = vmatpush.msrb.mxu2 %v2116_v8 }
 0x2ea   :  { %1098 = vmatpush.msrb.mxu0 %v2143_v15 }
 0x2eb   :  { %1220 = vmatpush.msrb.mxu1 %v2133_v11  ;;  %1240 = vmatpush.msrb.mxu2 %v2138_v14 }
 0x2ec   :  { %1099 = vmatpush.msrb.mxu0 %v2165_v23 }
 0x2ed   :  { %1221 = vmatpush.msrb.mxu1 %v2152_v20  ;;  %1241 = vmatpush.msrb.mxu2 %v2157_v21 }
 0x2ee   :  { %1100 = vmatpush.msrb.mxu0 %v2181_v29 }
 0x2ef   :  { %1222 = vmatpush.msrb.mxu1 %v2171_v26  ;;  %1242 = vmatpush.msrb.mxu2 %v2176_v27 }
 0x2f0   :  { %1101 = vmatpush.msrb.mxu0 %v2203_v35 }
 0x2f1   :  { %1223 = vmatpush.msrb.mxu1 %v2193_v32  ;;  %1243 = vmatpush.msrb.mxu2 %v2198_v33 }
 0x2f2   :  { %1102 = vmatpush.msrb.mxu0 %v2222_v19 }
 0x2f3   :  { %1224 = vmatpush.msrb.mxu1 %v2212_v13  ;;  %1244 = vmatpush.msrb.mxu2 %v2217_v16 }
 0x2f4   :  { %1103 = vmatpush.msrb.mxu0 %v2241_v31 }
 0x2f5   :  { %1225 = vmatpush.msrb.mxu1 %v2231_v25  ;;  %1245 = vmatpush.msrb.mxu2 %v2236_v28  ;;  %v1349_v28 = vld [vmem:[%s2503_s0 + $0x70] sm:$0xff] }
 0x2f6   :  { %1104 = vmatpush.msrb.mxu0 %v2259_v38 }
 0x2f7   :  { %1226 = vmatpush.msrb.mxu1 %v2249_v34  ;;  %1246 = vmatpush.msrb.mxu2 %v2254_v37 }
 0x2f8   :  { %1105 = vmatpush.msrb.mxu0 %v2278_v43 }
 0x2f9   :  { %1227 = vmatpush.msrb.mxu1 %v2265_v40  ;;  %1247 = vmatpush.msrb.mxu2 %v2270_v41 }
 0x356   :  { %v743_v50 = vpop.f32.mrf.mxu0  ;;  %v763_v52 = vpop.f32.mrf.mxu1 }
 0x357   :  { %v786_v53 = vadd.f32 %v1347_v48, %v743_v50  ;;  %v806_v55 = vadd.f32 %v1348_v49, %v763_v52  ;;  %v2464_v52 = vld [vmem:[%s2502_s3] ss:$0 sm:$0xff] }
 0x359   :  { %v1350_v56 = vmul.f32 -1.442695, %v786_v53  ;;  %v1351_v58 = vmul.f32 -1.442695, %v806_v55 }
 0x35b   :  { %1412 = vpow2.f32 %v1350_v56 }
 0x35c   :  { %1414 = vpow2.f32 %v1351_v58 }
 0x35d   :  { %v783_v27 = vpop.f32.mrf.mxu2 }
 0x35e   :  { %v826_v16 = vadd.f32 %v1911_v1, %v783_v27  ;;  %v1360_v27 = vld [vmem:[%s2503_s0 + $0x98] sm:$0xff] }
 0x361   :  { %v1413_v59 = vpop.eup %1412 }
 0x362   :  { %v1415_v61 = vpop.eup %1414  ;;  %v790_v62 = vadd.f32 1.0, %v1413_v59  ;;  %v1355_v59 = vld [vmem:[%s2503_s0 + $0x88] sm:$0xff] }
 0x363   :  { %v810_v0 = vadd.f32 1.0, %v1415_v61 }
 0x364   :  { %1416 = vrcp.f32 %v790_v62  ;;  %v802_v14 = vand.u32 2147483648, %v790_v62  ;;  %v800_v21 = vand.u32 2147483647, %v790_v62  ;;  %vm796_vm1 = vweird.f32 %v790_v62 }
 0x365   :  { %1418 = vrcp.f32 %v810_v0  ;;  %v822_v37 = vand.u32 2147483648, %v810_v0  ;;  %vm816_vm5 = vweird.f32 %v810_v0  ;;  %v820_v41 = vand.u32 2147483647, %v810_v0 }
 0x366   :  { %v803_v33 = vor.u32 1.1754944e-38, %v802_v14  ;;  %vm801_vm3 = vcmp.eq.f32.partialorder %v800_v21, 8.507059e+37 }
 0x367   :  { %v823_v24 = vor.u32 1.1754944e-38, %v822_v37  ;;  %vm821_vm7 = vcmp.eq.f32.partialorder %v820_v41, 8.507059e+37 }
 0x36a   :  { %v1417_v2 = vpop.eup %1416 }
 0x36b   :  { %v1419_v4 = vpop.eup %1418  ;;  %v792_v5 = vmul.f32 %v1417_v2, %v790_v62  ;;  %vm797_vm0 = vweird.f32 %v1417_v2 }
 0x36c   :  { %v812_v7 = vmul.f32 %v1419_v4, %v810_v0  ;;  %vm798_vm2 = vmor %vm796_vm1, %vm797_vm0  ;;  %vm817_vm4 = vweird.f32 %v1419_v4 }
 0x36d   :  { %v793_v8 = vsub.f32 1.0, %v792_v5  ;;  %vm818_vm6 = vmor %vm816_vm5, %vm817_vm4 }
 0x36e   :  { %v813_v11 = vsub.f32 1.0, %v812_v7 }
 0x36f   :  { %v794_v20 = vmul.f32 %v1417_v2, %v793_v8 }
 0x370   :  { %v814_v26 = vmul.f32 %v1419_v4, %v813_v11 }
 0x371   :  { %v795_v32 = vadd.f32 %v1417_v2, %v794_v20 }
 0x372   :  { %v815_v25 = vadd.f32 %v1419_v4, %v814_v26  ;;  %v1359_v26 = vld [vmem:[%s2503_s0 + $0x90] sm:$0xff] }
 0x373   :  { %v799_v13 = vsel %vm798_vm2, %v1417_v2, %v795_v32 }
 0x374   :  { %v804_v34 = vsel %vm801_vm3, %v803_v33, %v799_v13  ;;  %v819_v46 = vsel %vm818_vm6, %v1419_v4, %v815_v25 }
 0x375   :  { %v827_v40 = vmul.f32 %v826_v16, %v804_v34  ;;  %v824_v36 = vsel %vm821_vm7, %v823_v24, %v819_v46 }
 0x376   :  { %v830_v12 = vsub.f32 1.0, %v824_v36  ;;  %v832_v39 = vmul.f32 %v824_v36, %v2354_v18 }
 0x377   :  { %v828_v17 = vadd.f32 %v1349_v28, %v827_v40 }
 0x379   :  { %1420 = vtanh.f32 %v828_v17 }
 0x37f   :  { %v1421_v1 = vpop.eup %1420 }
 0x380   :  { %v831_v22 = vmul.f32 %v1421_v1, %v830_v12 }
 0x382   :  { %v2430_v44 = vadd.f32 %v832_v39, %v831_v22 }
 0x384   :  { %1352 = vst [vmem:[%s2504_s4 + $0x20] sm:$0xff] %v2430_v44  ;;  %904 = vmatmul.f32.vlgmr.msrb.gmra.mxu3 %v2430_v44  ;;  %924 = vmatmul.f32.vlgmr.msra.gmra.mxu0 %v2430_v44 }
 0x385   :  { %944 = vmatmul.f32.vlgmr.msra.gmra.mxu1 %v2430_v44  ;;  %1252 = vmatpush.msrb.mxu3 %v1989_v51  ;;  %v1354_v51 = vld [vmem:[%s2503_s0 + $0x80] sm:$0xff] }
 0x387   :  { %1253 = vmatpush.msrb.mxu3 %v2007_v54 }
 0x389   :  { %1254 = vmatpush.msrb.mxu3 %v2026_v57 }
 0x38b   :  { %1255 = vmatpush.msrb.mxu3 %v2045_v60 }
 0x38d   :  { %1256 = vmatpush.msrb.mxu3 %v2064_v63  ;;  %v1353_v63 = vld [vmem:[%s2503_s0 + $0x78] sm:$0xff] }
 0x38f   :  { %1257 = vmatpush.msrb.mxu3 %v2083_v3 }
 0x391   :  { %1258 = vmatpush.msrb.mxu3 %v2102_v6 }
 0x393   :  { %1259 = vmatpush.msrb.mxu3 %v2121_v9 }
 0x395   :  { %1260 = vmatpush.msrb.mxu3 %v2143_v15 }
 0x397   :  { %1261 = vmatpush.msrb.mxu3 %v2165_v23 }
 0x399   :  { %1262 = vmatpush.msrb.mxu3 %v2181_v29 }
 0x39b   :  { %1263 = vmatpush.msrb.mxu3 %v2203_v35 }
 0x39d   :  { %1264 = vmatpush.msrb.mxu3 %v2222_v19 }
 0x39f   :  { %1265 = vmatpush.msrb.mxu3 %v2241_v31 }
 0x3a1   :  { %1266 = vmatpush.msrb.mxu3 %v2259_v38 }
 0x3a3   :  { %1267 = vmatpush.msrb.mxu3 %v2278_v43 }
 0x401   :  { %v925_v54 = vpop.f32.mrf.mxu0 }
 0x402   :  { %v968_v57 = vadd.f32 %v1354_v51, %v925_v54  ;;  %v945_v48 = vpop.f32.mrf.mxu1 }
 0x403   :  { %v988_v53 = vadd.f32 %v2464_v52, %v945_v48 }
 0x404   :  { %v1357_v60 = vmul.f32 -1.442695, %v968_v57 }
 0x406   :  { %1422 = vpow2.f32 %v1357_v60 }
 0x407   :  { %v905_v3 = vpop.f32.mrf.mxu3 }
 0x408   :  { %v948_v6 = vadd.f32 %v1353_v63, %v905_v3 }
 0x40a   :  { %v1356_v9 = vmul.f32 -1.442695, %v948_v6 }
 0x40c   :  { %v1423_v15 = vpop.eup %1422  ;;  %1424 = vpow2.f32 %v1356_v9 }
 0x40d   :  { %v972_v23 = vadd.f32 1.0, %v1423_v15  ;;  %v1361_v15 = vld [vmem:[%s2503_s0 + $0xa0] sm:$0xff] }
 0x40f   :  { %1426 = vrcp.f32 %v972_v23  ;;  %v984_v61 = vand.u32 2147483648, %v972_v23  ;;  %vm978_vm13 = vweird.f32 %v972_v23  ;;  %v982_v0 = vand.u32 2147483647, %v972_v23 }
 0x411   :  { %v985_v5 = vor.u32 1.1754944e-38, %v984_v61  ;;  %vm983_vm15 = vcmp.eq.f32.partialorder %v982_v0, 8.507059e+37 }
 0x412   :  { %v1425_v29 = vpop.eup %1424 }
 0x413   :  { %v952_v35 = vadd.f32 1.0, %v1425_v29 }
 0x415   :  { %1428 = vrcp.f32 %v952_v35  ;;  %v1427_v19 = vpop.eup %1426  ;;  %v964_v47 = vand.u32 2147483648, %v952_v35  ;;  %v962_v42 = vand.u32 2147483647, %v952_v35  ;;  %vm958_vm9 = vweird.f32 %v952_v35 }
 0x416   :  { %v974_v31 = vmul.f32 %v1427_v19, %v972_v23  ;;  %vm979_vm12 = vweird.f32 %v1427_v19 }
 0x417   :  { %v965_v50 = vor.u32 1.1754944e-38, %v964_v47  ;;  %vm963_vm11 = vcmp.eq.f32.partialorder %v962_v42, 8.507059e+37  ;;  %vm980_vm14 = vmor %vm978_vm13, %vm979_vm12 }
 0x418   :  { %v975_v45 = vsub.f32 1.0, %v974_v31 }
 0x41a   :  { %v976_v18 = vmul.f32 %v1427_v19, %v975_v45 }
 0x41b   :  { %v1429_v38 = vpop.eup %1428 }
 0x41c   :  { %v954_v43 = vmul.f32 %v1429_v38, %v952_v35  ;;  %vm959_vm8 = vweird.f32 %v1429_v38  ;;  %v977_v56 = vadd.f32 %v1427_v19, %v976_v18  ;;  %v1365_v18 = vld [vmem:[%s2503_s0 + $0xa8] sm:$0xff] }
 0x41d   :  { %vm960_vm10 = vmor %vm958_vm9, %vm959_vm8 }
 0x41e   :  { %v955_v30 = vsub.f32 1.0, %v954_v43  ;;  %v981_v4 = vsel %vm980_vm14, %v1427_v19, %v977_v56 }
 0x41f   :  { %v986_v7 = vsel %vm983_vm15, %v985_v5, %v981_v4 }
 0x420   :  { %v956_v10 = vmul.f32 %v1429_v38, %v955_v30  ;;  %v992_v8 = vsub.f32 1.0, %v986_v7  ;;  %v994_v20 = vmul.f32 %v986_v7, %v2430_v44 }
 0x422   :  { %v957_v49 = vadd.f32 %v1429_v38, %v956_v10 }
 0x424   :  { %v961_v55 = vsel %vm960_vm10, %v1429_v38, %v957_v49 }
 0x425   :  { %v966_v58 = vsel %vm963_vm11, %v965_v50, %v961_v55 }
 0x426   :  { %v989_v62 = vmul.f32 %v988_v53, %v966_v58  ;;  %v1366_v53 = vld [vmem:[%s2503_s0 + $0xb0] sm:$0xff] }
 0x428   :  { %v990_v2 = vadd.f32 %v1355_v59, %v989_v62 }
 0x42a   :  { %1430 = vtanh.f32 %v990_v2 }
 0x430   :  { %v1431_v11 = vpop.eup %1430 }
 0x431   :  { %v993_v14 = vmul.f32 %v1431_v11, %v992_v8 }
 0x433   :  { %v995_v21 = vadd.f32 %v994_v20, %v993_v14 }
 0x435   :  { %1358 = vst [vmem:[%s2504_s4 + $0x28] sm:$0xff] %v995_v21  ;;  %1066 = vmatmul.f32.vlgmr.msra.gmra.mxu2 %v995_v21  ;;  %1086 = vmatmul.f32.vlgmr.msra.gmra.mxu3 %v995_v21 }
 0x436   :  { %1106 = vmatmul.f32.vlgmr.msrb.gmra.mxu0 %v995_v21 }
 0x4b3   :  { %v1107_v51 = vpop.f32.mrf.mxu0 }
 0x4b4   :  { %v1150_v63 = vadd.f32 %v2464_v52, %v1107_v51 }
 0x4b8   :  { %v1067_v32 = vpop.f32.mrf.mxu2  ;;  %v1087_v33 = vpop.f32.mrf.mxu3 }
 0x4b9   :  { %v1110_v13 = vadd.f32 %v1359_v26, %v1067_v32  ;;  %v1130_v16 = vadd.f32 %v1360_v27, %v1087_v33 }
 0x4bb   :  { %v1362_v25 = vmul.f32 -1.442695, %v1110_v13  ;;  %v1363_v28 = vmul.f32 -1.442695, %v1130_v16  ;;  %v1367_v16 = vld [vmem:[%s2503_s0 + $0xb8] sm:$0xff] }
 0x4bd   :  { %1432 = vpow2.f32 %v1362_v25 }
 0x4be   :  { %1434 = vpow2.f32 %v1363_v28 }
 0x4c3   :  { %v1433_v34 = vpop.eup %1432 }
 0x4c4   :  { %v1435_v37 = vpop.eup %1434  ;;  %v1114_v40 = vadd.f32 1.0, %v1433_v34 }
 0x4c5   :  { %v1134_v41 = vadd.f32 1.0, %v1435_v37 }
 0x4c6   :  { %1436 = vrcp.f32 %v1114_v40  ;;  %v1126_v1 = vand.u32 2147483648, %v1114_v40  ;;  %v1124_v44 = vand.u32 2147483647, %v1114_v40  ;;  %vm1120_vm1 = vweird.f32 %v1114_v40 }
 0x4c7   :  { %1438 = vrcp.f32 %v1134_v41  ;;  %v1146_v29 = vand.u32 2147483648, %v1134_v41  ;;  %vm1140_vm5 = vweird.f32 %v1134_v41  ;;  %v1144_v35 = vand.u32 2147483647, %v1134_v41 }
 0x4c8   :  { %v1127_v60 = vor.u32 1.1754944e-38, %v1126_v1  ;;  %vm1125_vm3 = vcmp.eq.f32.partialorder %v1124_v44, 8.507059e+37 }
 0x4c9   :  { %v1147_v38 = vor.u32 1.1754944e-38, %v1146_v29  ;;  %vm1145_vm7 = vcmp.eq.f32.partialorder %v1144_v35, 8.507059e+37 }
 0x4cc   :  { %v1437_v17 = vpop.eup %1436 }
 0x4cd   :  { %v1439_v46 = vpop.eup %1438  ;;  %v1116_v24 = vmul.f32 %v1437_v17, %v1114_v40  ;;  %vm1121_vm0 = vweird.f32 %v1437_v17 }
 0x4ce   :  { %v1136_v36 = vmul.f32 %v1439_v46, %v1134_v41  ;;  %vm1122_vm2 = vmor %vm1120_vm1, %vm1121_vm0  ;;  %vm1141_vm4 = vweird.f32 %v1439_v46 }
 0x4cf   :  { %v1117_v12 = vsub.f32 1.0, %v1116_v24  ;;  %vm1142_vm6 = vmor %vm1140_vm5, %vm1141_vm4 }
 0x4d0   :  { %v1137_v22 = vsub.f32 1.0, %v1136_v36 }
 0x4d1   :  { %v1118_v39 = vmul.f32 %v1437_v17, %v1117_v12 }
 0x4d2   :  { %v1138_v54 = vmul.f32 %v1439_v46, %v1137_v22 }
 0x4d3   :  { %v1119_v57 = vadd.f32 %v1437_v17, %v1118_v39 }
 0x4d4   :  { %v1139_v9 = vadd.f32 %v1439_v46, %v1138_v54 }
 0x4d5   :  { %v1123_v3 = vsel %vm1122_vm2, %v1437_v17, %v1119_v57 }
 0x4d6   :  { %v1128_v6 = vsel %vm1125_vm3, %v1127_v60, %v1123_v3  ;;  %v1143_v31 = vsel %vm1142_vm6, %v1439_v46, %v1139_v9 }
 0x4d7   :  { %v1151_v23 = vmul.f32 %v1150_v63, %v1128_v6  ;;  %v1148_v43 = vsel %vm1145_vm7, %v1147_v38, %v1143_v31 }
 0x4d8   :  { %v1154_v45 = vsub.f32 1.0, %v1148_v43  ;;  %v1156_v10 = vmul.f32 %v1148_v43, %v995_v21 }
 0x4d9   :  { %v1152_v19 = vadd.f32 %v1361_v15, %v1151_v23 }
 0x4db   :  { %1440 = vtanh.f32 %v1152_v19 }
 0x4e1   :  { %v1441_v30 = vpop.eup %1440 }
 0x4e2   :  { %v1155_v47 = vmul.f32 %v1441_v30, %v1154_v45 }
 0x4e4   :  { %v1157_v42 = vadd.f32 %v1156_v10, %v1155_v47 }
 0x4e6   :  { %1364 = vst [vmem:[%s2504_s4 + $0x30] sm:$0xff] %v1157_v42  ;;  %1228 = vmatmul.f32.vlgmr.msrb.gmra.mxu1 %v1157_v42  ;;  %1248 = vmatmul.f32.vlgmr.msrb.gmra.mxu2 %v1157_v42 }
 0x4e7   :  { %1268 = vmatmul.f32.vlgmr.msrb.gmra.mxu3 %v1157_v42 }
 0x563   :  { %v1229_v48 = vpop.f32.mrf.mxu1 }
 0x564   :  { %v1272_v49 = vadd.f32 %v1365_v18, %v1229_v48 }
 0x566   :  { %v1368_v50 = vmul.f32 -1.442695, %v1272_v49 }
 0x568   :  { %1442 = vpow2.f32 %v1368_v50 }
 0x569   :  { %v1249_v55 = vpop.f32.mrf.mxu2 }
 0x56a   :  { %v1292_v56 = vadd.f32 %v1366_v53, %v1249_v55  ;;  %v1269_v20 = vpop.f32.mrf.mxu3 }
 0x56b   :  { %v1312_v13 = vadd.f32 %v2464_v52, %v1269_v20 }
 0x56c   :  { %v1369_v58 = vmul.f32 -1.442695, %v1292_v56 }
 0x56e   :  { %v1443_v59 = vpop.eup %1442  ;;  %1444 = vpow2.f32 %v1369_v58 }
 0x56f   :  { %v1276_v61 = vadd.f32 1.0, %v1443_v59 }
 0x571   :  { %1446 = vrcp.f32 %v1276_v61  ;;  %v1288_v7 = vand.u32 2147483648, %v1276_v61  ;;  %v1286_v11 = vand.u32 2147483647, %v1276_v61  ;;  %vm1282_vm9 = vweird.f32 %v1276_v61 }
 0x573   :  { %v1289_v27 = vor.u32 1.1754944e-38, %v1288_v7  ;;  %vm1287_vm11 = vcmp.eq.f32.partialorder %v1286_v11, 8.507059e+37 }
 0x574   :  { %v1445_v62 = vpop.eup %1444 }
 0x575   :  { %v1296_v0 = vadd.f32 1.0, %v1445_v62 }
 0x577   :  { %v1447_v2 = vpop.eup %1446  ;;  %1448 = vrcp.f32 %v1296_v0  ;;  %v1308_v34 = vand.u32 2147483648, %v1296_v0  ;;  %v1306_v40 = vand.u32 2147483647, %v1296_v0  ;;  %vm1302_vm13 = vweird.f32 %v1296_v0 }
 0x578   :  { %v1278_v4 = vmul.f32 %v1447_v2, %v1276_v61  ;;  %vm1283_vm8 = vweird.f32 %v1447_v2 }
 0x579   :  { %vm1284_vm10 = vmor %vm1282_vm9, %vm1283_vm8  ;;  %v1309_v46 = vor.u32 1.1754944e-38, %v1308_v34  ;;  %vm1307_vm15 = vcmp.eq.f32.partialorder %v1306_v40, 8.507059e+37 }
 0x57a   :  { %v1279_v5 = vsub.f32 1.0, %v1278_v4 }
 0x57c   :  { %v1280_v8 = vmul.f32 %v1447_v2, %v1279_v5 }
 0x57d   :  { %v1449_v14 = vpop.eup %1448 }
 0x57e   :  { %v1298_v21 = vmul.f32 %v1449_v14, %v1296_v0  ;;  %v1281_v26 = vadd.f32 %v1447_v2, %v1280_v8  ;;  %vm1303_vm12 = vweird.f32 %v1449_v14 }
 0x57f   :  { %vm1304_vm14 = vmor %vm1302_vm13, %vm1303_vm12 }
 0x580   :  { %v1299_v32 = vsub.f32 1.0, %v1298_v21  ;;  %v1285_v33 = vsel %vm1284_vm10, %v1447_v2, %v1281_v26 }
 0x581   :  { %v1290_v25 = vsel %vm1287_vm11, %v1289_v27, %v1285_v33 }
 0x582   :  { %v1300_v28 = vmul.f32 %v1449_v14, %v1299_v32  ;;  %v1313_v37 = vmul.f32 %v1312_v13, %v1290_v25 }
 0x584   :  { %v1301_v41 = vadd.f32 %v1449_v14, %v1300_v28  ;;  %v1314_v17 = vadd.f32 %v1367_v16, %v1313_v37 }
 0x586   :  { %v1305_v24 = vsel %vm1304_vm14, %v1449_v14, %v1301_v41  ;;  %1450 = vtanh.f32 %v1314_v17 }
 0x587   :  { %v1310_v36 = vsel %vm1307_vm15, %v1309_v46, %v1305_v24 }
 0x588   :  { %v1316_v52 = vsub.f32 1.0, %v1310_v36  ;;  %v1318_v22 = vmul.f32 %v1310_v36, %v1157_v42 }
 0x58c   :  { %v1451_v12 = vpop.eup %1450 }
 0x58d   :  { %v1317_v1 = vmul.f32 %v1451_v12, %v1316_v52 }
 0x58f   :  { %v1319_v39 = vadd.f32 %v1318_v22, %v1317_v1 }
 0x591   :  { %1370 = vst [vmem:[%s2504_s4 + $0x38] sm:$0xff] %v1319_v39 }

</bundles_post_ra>
